<compile_context>
chip_gen: v7x
topology: tpu7x:2x2x1
jax: 0.10.0
libtpu: 0.0.40
codegen_flags: <defaults>
</compile_context>

<pallas_src>
import jax
import jax.numpy as jnp
from jax.experimental import pallas as pl
from jax.experimental.pallas import tpu as pltpu


def add_relu_matmul_kernel(a_ref, b_ref, w_ref, o_ref):
    # a_ref, b_ref: (C_in, M) f32   w_ref: (Cout_blk, C_in) bf16
    # o_ref:        (Cout_blk, M) f32
    # add + ReLU in f32 on the VPU (safe on v5e, which has no bf16 VALU).
    x = jnp.maximum(a_ref[...] + b_ref[...], 0.0)
    # Cast only the activations to the weight's (bf16) dtype for the MXU;
    # accumulate in f32 via preferred_element_type.
    x = x.astype(w_ref.dtype)
    o_ref[...] = jnp.dot(
        w_ref[...], x, preferred_element_type=jnp.float32
    ).astype(o_ref.dtype)


def prepare_conv1x1_weight(weight, matmul_dtype=jnp.bfloat16):
    """(C_out, C_in, 1, 1) conv weight -> (C_out, C_in) matmul LHS.

    Done once at parameter-prep time so the Pallas kernel reads bf16 from HBM
    (half the weight traffic) instead of casting a freshly-DMA'd f32 tile.
    """
    C_out, C_in = weight.shape[0], weight.shape[1]
    return weight.reshape(C_out, C_in).astype(matmul_dtype)


def fused_add_relu_conv1x1(x468, x460, w2d, *, block_cout=None):
    """x468, x460: (1, C_in, H, W) float32.  w2d: (C_out, C_in) (bf16 recommended)."""
    N, C, H, W = x468.shape
    Cout = w2d.shape[0]
    assert N == 1, "channels-major fast path assumes N == 1 (pure reshapes)"
    assert w2d.shape[1] == C
    M = H * W  # 196 pixels

    # Pure reshapes -- no data movement, no extra XLA transpose ops.
    a = x468.reshape(C, M)  # (C_in, M)
    b = x460.reshape(C, M)  # (C_in, M)

    # Default: single grid step (kernel is HBM/overhead bound; splitting C_out
    # only adds per-step overhead and, under megacore, duplicated activation
    # DMA).  block_cout < Cout is kept available for v7x experiments.
    bc = Cout if block_cout is None or (Cout % block_cout != 0) else block_cout
    grid = (Cout // bc,)

    w_bytes = w2d.dtype.itemsize
    cost = pl.CostEstimate(
        flops=2 * M * C * Cout,
        transcendentals=0,
        bytes_accessed=4 * (2 * M * C + M * Cout) + w_bytes * C * Cout,
    )

    out = pl.pallas_call(
        add_relu_matmul_kernel,
        out_shape=jax.ShapeDtypeStruct((Cout, M), x468.dtype),
        grid=grid,
        in_specs=[
            # Activations: full (C_in, M) block, same block every grid step.
            pl.BlockSpec((C, M), lambda i: (0, 0)),
            pl.BlockSpec((C, M), lambda i: (0, 0)),
            # Weight: one slab of output channels per grid step (whole weight
            # in the default single-step configuration).
            pl.BlockSpec((bc, C), lambda i: (i, 0)),
        ],
        out_specs=pl.BlockSpec((bc, M), lambda i: (i, 0)),
        compiler_params=pltpu.CompilerParams(
            dimension_semantics=("parallel",)),
        cost_estimate=cost,
    )(a, b, w2d)

    # (C_out, M) -> (1, C_out, H, W): pure reshape, matches NCHW output.
    return out.reshape(N, Cout, H, W)


if __name__ == "__main__":
    key = jax.random.PRNGKey(0)
    k1, k2, k3 = jax.random.split(key, 3)

    # Shapes implied by the module's forward / conv definition.
    N, C_in, H, W = 1, 1024, 14, 14
    C_out = 256

    x468 = jax.random.normal(k1, (N, C_in, H, W), dtype=jnp.float32)
    x460 = jax.random.normal(k2, (N, C_in, H, W), dtype=jnp.float32)
    # Deterministic conv weight init (kaiming-uniform-like scale), no bias.
    bound = 1.0 / (C_in ** 0.5)
    weight = jax.random.uniform(
        k3, (C_out, C_in, 1, 1), dtype=jnp.float32, minval=-bound, maxval=bound
    )

    # Pure-JAX f32 reference of the fused semantics.
    ref = jnp.einsum(
        "nchw,oc->nohw",
        jnp.maximum(x468 + x460, 0.0),
        weight.reshape(C_out, C_in),
    )

    # Parameter-prep: convert the conv weight to bf16 once, outside the kernel.
    w2d = jax.block_until_ready(prepare_conv1x1_weight(weight))

    # Default path: bf16 matmul operands, f32 accumulate, single grid step.
    out = jax.block_until_ready(fused_add_relu_conv1x1(x468, x460, w2d))
    assert out.shape == (N, C_out, H, W), out.shape
    # bf16 operand quantization of weight + post-ReLU activations -> loose tol.
    assert jnp.allclose(out, ref, atol=1e-1, rtol=1e-1)

    # Optional v7x megacore experiment: 2-way C_out split (same numerics).
    out_split = jax.block_until_ready(
        fused_add_relu_conv1x1(x468, x460, w2d, block_cout=128)
    )
    assert out_split.shape == (N, C_out, H, W), out_split.shape
    assert jnp.allclose(out_split, ref, atol=1e-1, rtol=1e-1)

    print("KERNEL_OK")
</pallas_src>

<mosaic_0001>
module attributes {stable_mosaic.version = 11 : i64} {
  func.func @add_relu_matmul_kernel(%arg0: i32, %arg1: memref<1024x196xf32, #tpu.memory_space<vmem>>, %arg2: memref<1024x196xf32, #tpu.memory_space<vmem>>, %arg3: memref<256x1024xbf16, #tpu.memory_space<vmem>>, %arg4: memref<256x196xf32, #tpu.memory_space<vmem>>) attributes {dimension_semantics = [#tpu.dimension_semantics<parallel>], iteration_bounds = array<i64: 1>, scalar_prefetch = 0 : i64, scratch_operands = 0 : i64, tpu.core_type = #tpu.core_type<tc>, window_params = [{pipeline_mode = #tpu.pipeline_mode<synchronous>, transform_indices = @transform_0, window_bounds = array<i64: 1024, 196>}, {pipeline_mode = #tpu.pipeline_mode<synchronous>, transform_indices = @transform_1, window_bounds = array<i64: 1024, 196>}, {transform_indices = @transform_2, window_bounds = array<i64: 256, 1024>}, {transform_indices = @transform_3, window_bounds = array<i64: 256, 196>}]} {
    %c0 = arith.constant 0 : index
    %c0_0 = arith.constant 0 : index
    %0 = vector.load %arg1[%c0, %c0_0] : memref<1024x196xf32, #tpu.memory_space<vmem>>, vector<1024x196xf32>
    %c0_1 = arith.constant 0 : index
    %c0_2 = arith.constant 0 : index
    %1 = vector.load %arg2[%c0_1, %c0_2] : memref<1024x196xf32, #tpu.memory_space<vmem>>, vector<1024x196xf32>
    %2 = arith.addf %0, %1 : vector<1024x196xf32>
    %cst = arith.constant 0.000000e+00 : f32
    %3 = vector.broadcast %cst : f32 to vector<1024x196xf32>
    %4 = arith.maximumf %2, %3 : vector<1024x196xf32>
    %5 = arith.truncf %4 : vector<1024x196xf32> to vector<1024x196xbf16>
    %c0_3 = arith.constant 0 : index
    %c0_4 = arith.constant 0 : index
    %6 = vector.load %arg3[%c0_3, %c0_4] : memref<256x1024xbf16, #tpu.memory_space<vmem>>, vector<256x1024xbf16>
    %cst_5 = arith.constant dense<0.000000e+00> : vector<256x196xf32>
    %7 = tpu.matmul %6, %5, %cst_5 {dimension_numbers = #tpu.dot_dimension_numbers<[1], [0], [0], [1], [0, 0, 1, 1], [], []>} : vector<256x1024xbf16>, vector<1024x196xbf16>, vector<256x196xf32> -> vector<256x196xf32>
    %c0_6 = arith.constant 0 : index
    %c0_7 = arith.constant 0 : index
    %8 = vector.load %arg4[%c0_6, %c0_7] : memref<256x196xf32, #tpu.memory_space<vmem>>, vector<256x196xf32>
    tpu.vector_store %arg4[%c0_6, %c0_7], %7 {strides = array<i32>} : memref<256x196xf32, #tpu.memory_space<vmem>>, vector<256x196xf32>,
    return
  }
  func.func @transform_0(%arg0: i32) -> (i32, i32) {
    %c0_i32 = arith.constant 0 : i32
    %c0_i32_0 = arith.constant 0 : i32
    %c0_i32_1 = arith.constant 0 : i32
    return %c0_i32, %c0_i32_0 : i32, i32
  }
  func.func @transform_1(%arg0: i32) -> (i32, i32) {
    %c0_i32 = arith.constant 0 : i32
    %c0_i32_0 = arith.constant 0 : i32
    %c0_i32_1 = arith.constant 0 : i32
    return %c0_i32, %c0_i32_0 : i32, i32
  }
  func.func @transform_2(%arg0: i32) -> (i32, i32) {
    %c0_i32 = arith.constant 0 : i32
    %c0_i32_0 = arith.constant 0 : i32
    return %arg0, %c0_i32 : i32, i32
  }
  func.func @transform_3(%arg0: i32) -> (i32, i32) {
    %c0_i32 = arith.constant 0 : i32
    %c0_i32_0 = arith.constant 0 : i32
    return %arg0, %c0_i32 : i32, i32
  }
}

</mosaic_0001>

<bundles_post_ra>
// kernel: tpu_custom_call.1
= control target key start
LH: loop header
LB: loop body
LE: loop exit
PB: predicated region body
PF: predicated region fallthrough
CT: control target
= control target key end

     0   :  { %vm2707_vm0 = vcmask 556032   ;;  %s5467_s0 = inlined_call_operand.vmem [shape: f32[1024,196], index: 0, kind: input, shape index: {}]   ;;  %s5468_s1 = inlined_call_operand.vmem [shape: f32[1024,196], index: 1, kind: input, shape index: {}]   ;;  %s5469_s2 = inlined_call_operand.vmem [shape: bf16[256,1024], index: 2, kind: input, shape index: {}]   ;;  %s5470_s3 = inlined_call_operand.vmem [shape: f32[256,196], index: 3, kind: output, shape index: {}]  }
   0x1   :  { %v15_v0 = vld [vmem:[%s5467_s0 + $0x8] sm:$0xff]  ;;  %v17_v1 = vld [vmem:[%s5467_s0 + $0x18] sm:$0xff]  ;;  %v14_v10 = vld [vmem:[%s5467_s0] sm:$0xff] }
   0x2   :  { %v271_v2 = vld [vmem:[%s5468_s1 + $0x8] sm:$0xff]  ;;  %v273_v3 = vld [vmem:[%s5468_s1 + $0x18] sm:$0xff]  ;;  %v16_v14 = vld [vmem:[%s5467_s0 + $0x10] sm:$0xff] }
   0x3   :  { %v527_v4 = vadd.f32 %v271_v2, %v15_v0  ;;  %v143_v5 = vld [vmem:[%s5467_s0 + $0x408] sm:$0xff]  ;;  %v145_v6 = vld [vmem:[%s5467_s0 + $0x418] sm:$0xff]  ;;  %v529_v7 = vadd.f32 %v273_v3, %v17_v1  ;;  %v270_v15 = vld [vmem:[%s5468_s1] sm:$0xff] }
   0x4   :  { %v399_v8 = vld [vmem:[%s5468_s1 + $0x408] sm:$0xff]  ;;  %v401_v9 = vld [vmem:[%s5468_s1 + $0x418] sm:$0xff]  ;;  %v272_v16 = vld [vmem:[%s5468_s1 + $0x10] sm:$0xff]  ;;  %v526_v18 = vadd.f32 %v270_v15, %v14_v10 }
   0x5   :  { %v783_v11 = vmax.f32 %v527_v4, 0.0  ;;  %v655_v12 = vadd.f32 %v399_v8, %v143_v5  ;;  %v657_v13 = vadd.f32 %v401_v9, %v145_v6  ;;  %v785_v17 = vmax.f32 %v529_v7, 0.0  ;;  %v142_v20 = vld [vmem:[%s5467_s0 + $0x400] sm:$0xff]  ;;  %v144_v21 = vld [vmem:[%s5467_s0 + $0x410] sm:$0xff]  ;;  %v19_v27 = vld [vmem:[%s5467_s0 + $0x28] sm:$0xff] }
   0x6   :  { %v528_v19 = vadd.f32 %v272_v16, %v16_v14  ;;  %v398_v22 = vld [vmem:[%s5468_s1 + $0x400] sm:$0xff]  ;;  %v400_v25 = vld [vmem:[%s5468_s1 + $0x410] sm:$0xff]  ;;  %v21_v28 = vld [vmem:[%s5467_s0 + $0x38] sm:$0xff]  ;;  %v782_v30 = vmax.f32 %v526_v18, 0.0 }
   0x7   :  { %v911_v23 = vmax.f32 %v655_v12, 0.0  ;;  %v913_v24 = vmax.f32 %v657_v13, 0.0  ;;  %v654_v26 = vadd.f32 %v398_v22, %v142_v20  ;;  %v1039_v29 = vpack.c.bf16 %v785_v17, %v783_v11  ;;  %v275_v33 = vld [vmem:[%s5468_s1 + $0x28] sm:$0xff]  ;;  %v277_v34 = vld [vmem:[%s5468_s1 + $0x38] sm:$0xff]  ;;  %v18_v47 = vld [vmem:[%s5467_s0 + $0x20] sm:$0xff] }
   0x8   :  { %v784_v31 = vmax.f32 %v528_v19, 0.0  ;;  %v656_v32 = vadd.f32 %v400_v25, %v144_v21  ;;  %v147_v35 = vld [vmem:[%s5467_s0 + $0x428] sm:$0xff]  ;;  %v531_v38 = vadd.f32 %v275_v33, %v19_v27  ;;  %v533_v39 = vadd.f32 %v277_v34, %v21_v28  ;;  %v149_v40 = vld [vmem:[%s5467_s0 + $0x438] sm:$0xff]  ;;  %v20_v48 = vld [vmem:[%s5467_s0 + $0x30] sm:$0xff] }
   0x9   :  { %v1103_v36 = vpack.c.bf16 %v913_v24, %v911_v23  ;;  %v910_v37 = vmax.f32 %v654_v26, 0.0  ;;  %v403_v41 = vld [vmem:[%s5468_s1 + $0x428] sm:$0xff]  ;;  %v405_v42 = vld [vmem:[%s5468_s1 + $0x438] sm:$0xff]  ;;  %1934 = vmatprep.subr.bf16.mxu1 %v1039_v29  ;;  %v274_v49 = vld [vmem:[%s5468_s1 + $0x20] sm:$0xff] }
   0xa   :  { %v1038_v43 = vpack.c.bf16 %v784_v31, %v782_v30  ;;  %v912_v44 = vmax.f32 %v656_v32, 0.0  ;;  %v659_v45 = vadd.f32 %v403_v41, %v147_v35  ;;  %v661_v46 = vadd.f32 %v405_v42, %v149_v40  ;;  %v276_v52 = vld [vmem:[%s5468_s1 + $0x30] sm:$0xff]  ;;  %v146_v54 = vld [vmem:[%s5467_s0 + $0x420] sm:$0xff]  ;;  %v23_v62 = vld [vmem:[%s5467_s0 + $0x48] sm:$0xff] }
   0xb   :  { %2320 = vmatprep.subr.bf16.mxu0 %v1103_v36  ;;  %v787_v50 = vmax.f32 %v531_v38, 0.0  ;;  %v789_v51 = vmax.f32 %v533_v39, 0.0  ;;  %v530_v53 = vadd.f32 %v274_v49, %v18_v47  ;;  %v148_v55 = vld [vmem:[%s5467_s0 + $0x430] sm:$0xff]  ;;  %v532_v59 = vadd.f32 %v276_v52, %v20_v48  ;;  %v402_v60 = vld [vmem:[%s5468_s1 + $0x420] sm:$0xff]  ;;  %v25_v3 = vld [vmem:[%s5467_s0 + $0x58] sm:$0xff] }
   0xc   :  { %1935 = vmatpush1.bf16.msra.mxu1 %v1038_v43  ;;  %v1102_v56 = vpack.c.bf16 %v912_v44, %v910_v37  ;;  %v915_v57 = vmax.f32 %v659_v45, 0.0  ;;  %v917_v58 = vmax.f32 %v661_v46, 0.0  ;;  %v404_v61 = vld [vmem:[%s5468_s1 + $0x430] sm:$0xff]  ;;  %v658_v1 = vadd.f32 %v402_v60, %v146_v54  ;;  %v279_v4 = vld [vmem:[%s5468_s1 + $0x48] sm:$0xff]  ;;  %v281_v5 = vld [vmem:[%s5468_s1 + $0x58] sm:$0xff] }
   0xd   :  { %v1041_v63 = vpack.c.bf16 %v789_v51, %v787_v50  ;;  %v786_v0 = vmax.f32 %v530_v53, 0.0  ;;  %v660_v2 = vadd.f32 %v404_v61, %v148_v55  ;;  %v788_v7 = vmax.f32 %v532_v59, 0.0  ;;  %v151_v10 = vld [vmem:[%s5467_s0 + $0x448] sm:$0xff]  ;;  %v153_v11 = vld [vmem:[%s5467_s0 + $0x458] sm:$0xff]  ;;  %v22_v17 = vld [vmem:[%s5467_s0 + $0x40] sm:$0xff] }
   0xe   :  { %2321 = vmatpush1.bf16.msra.mxu0 %v1102_v56  ;;  %v1105_v6 = vpack.c.bf16 %v917_v58, %v915_v57  ;;  %v535_v8 = vadd.f32 %v279_v4, %v23_v62  ;;  %v537_v9 = vadd.f32 %v281_v5, %v25_v3  ;;  %v407_v12 = vld [vmem:[%s5468_s1 + $0x448] sm:$0xff]  ;;  %v914_v13 = vmax.f32 %v658_v1, 0.0  ;;  %v409_v15 = vld [vmem:[%s5468_s1 + $0x458] sm:$0xff]  ;;  %v24_v18 = vld [vmem:[%s5467_s0 + $0x50] sm:$0xff] }
   0xf   :  { %1936 = vmatprep.subr.bf16.mxu1 %v1041_v63  ;;  %v916_v14 = vmax.f32 %v660_v2, 0.0  ;;  %v663_v16 = vadd.f32 %v407_v12, %v151_v10  ;;  %v1040_v19 = vpack.c.bf16 %v788_v7, %v786_v0  ;;  %v665_v22 = vadd.f32 %v409_v15, %v153_v11  ;;  %v278_v23 = vld [vmem:[%s5468_s1 + $0x40] sm:$0xff]  ;;  %v280_v24 = vld [vmem:[%s5468_s1 + $0x50] sm:$0xff]  ;;  %v27_v37 = vld [vmem:[%s5467_s0 + $0x68] sm:$0xff] }
  0x10   :  { %2322 = vmatprep.subr.bf16.mxu0 %v1105_v6  ;;  %v791_v20 = vmax.f32 %v535_v8, 0.0  ;;  %v793_v21 = vmax.f32 %v537_v9, 0.0  ;;  %v150_v25 = vld [vmem:[%s5467_s0 + $0x440] sm:$0xff]  ;;  %v534_v28 = vadd.f32 %v278_v23, %v22_v17  ;;  %v536_v29 = vadd.f32 %v280_v24, %v24_v18  ;;  %v152_v30 = vld [vmem:[%s5467_s0 + $0x450] sm:$0xff]  ;;  %v29_v38 = vld [vmem:[%s5467_s0 + $0x78] sm:$0xff] }
  0x11   :  { %v1104_v26 = vpack.c.bf16 %v916_v14, %v914_v13  ;;  %v919_v27 = vmax.f32 %v663_v16, 0.0  ;;  %v406_v31 = vld [vmem:[%s5468_s1 + $0x440] sm:$0xff]  ;;  %v408_v32 = vld [vmem:[%s5468_s1 + $0x450] sm:$0xff]  ;;  %1937 = vmatpush1.bf16.msra.mxu1 %v1040_v19  ;;  %v921_v34 = vmax.f32 %v665_v22, 0.0  ;;  %v283_v39 = vld [vmem:[%s5468_s1 + $0x68] sm:$0xff] }
  0x12   :  { %v1043_v33 = vpack.c.bf16 %v793_v21, %v791_v20  ;;  %v662_v35 = vadd.f32 %v406_v31, %v150_v25  ;;  %v664_v36 = vadd.f32 %v408_v32, %v152_v30  ;;  %v790_v40 = vmax.f32 %v534_v28, 0.0  ;;  %v285_v42 = vld [vmem:[%s5468_s1 + $0x78] sm:$0xff]  ;;  %v155_v44 = vld [vmem:[%s5467_s0 + $0x468] sm:$0xff]  ;;  %v26_v52 = vld [vmem:[%s5467_s0 + $0x60] sm:$0xff] }
  0x13   :  { %2323 = vmatpush1.bf16.msra.mxu0 %v1104_v26  ;;  %v792_v41 = vmax.f32 %v536_v29, 0.0  ;;  %v539_v43 = vadd.f32 %v283_v39, %v27_v37  ;;  %v157_v45 = vld [vmem:[%s5467_s0 + $0x478] sm:$0xff]  ;;  %v1107_v46 = vpack.c.bf16 %v921_v34, %v919_v27  ;;  %v541_v49 = vadd.f32 %v285_v42, %v29_v38  ;;  %v411_v50 = vld [vmem:[%s5468_s1 + $0x468] sm:$0xff]  ;;  %v28_v57 = vld [vmem:[%s5467_s0 + $0x70] sm:$0xff] }
  0x14   :  { %1938 = vmatprep.subr.bf16.mxu1 %v1043_v33  ;;  %v918_v47 = vmax.f32 %v662_v35, 0.0  ;;  %v920_v48 = vmax.f32 %v664_v36, 0.0  ;;  %v413_v51 = vld [vmem:[%s5468_s1 + $0x478] sm:$0xff]  ;;  %v667_v55 = vadd.f32 %v411_v50, %v155_v44  ;;  %v282_v58 = vld [vmem:[%s5468_s1 + $0x60] sm:$0xff]  ;;  %v284_v59 = vld [vmem:[%s5468_s1 + $0x70] sm:$0xff] }
  0x15   :  { %v1042_v53 = vpack.c.bf16 %v792_v41, %v790_v40  ;;  %v795_v54 = vmax.f32 %v539_v43, 0.0  ;;  %v669_v56 = vadd.f32 %v413_v51, %v157_v45  ;;  %2324 = vmatprep.subr.bf16.mxu0 %v1107_v46  ;;  %v797_v61 = vmax.f32 %v541_v49, 0.0  ;;  %v154_v0 = vld [vmem:[%s5467_s0 + $0x460] sm:$0xff]  ;;  %v156_v1 = vld [vmem:[%s5467_s0 + $0x470] sm:$0xff]  ;;  %v31_v7 = vld [vmem:[%s5467_s0 + $0x88] sm:$0xff] }
  0x16   :  { %v1106_v60 = vpack.c.bf16 %v920_v48, %v918_v47  ;;  %v538_v62 = vadd.f32 %v282_v58, %v26_v52  ;;  %v540_v63 = vadd.f32 %v284_v59, %v28_v57  ;;  %v410_v2 = vld [vmem:[%s5468_s1 + $0x460] sm:$0xff]  ;;  %v923_v3 = vmax.f32 %v667_v55, 0.0  ;;  %v412_v5 = vld [vmem:[%s5468_s1 + $0x470] sm:$0xff]  ;;  %v33_v8 = vld [vmem:[%s5467_s0 + $0x98] sm:$0xff] }
  0x17   :  { %1939 = vmatpush1.bf16.msra.mxu1 %v1042_v53  ;;  %v925_v4 = vmax.f32 %v669_v56, 0.0  ;;  %v666_v6 = vadd.f32 %v410_v2, %v154_v0  ;;  %v1045_v9 = vpack.c.bf16 %v797_v61, %v795_v54  ;;  %v668_v12 = vadd.f32 %v412_v5, %v156_v1  ;;  %v287_v13 = vld [vmem:[%s5468_s1 + $0x88] sm:$0xff]  ;;  %v289_v14 = vld [vmem:[%s5468_s1 + $0x98] sm:$0xff]  ;;  %v30_v27 = vld [vmem:[%s5467_s0 + $0x80] sm:$0xff] }
  0x18   :  { %2325 = vmatpush1.bf16.msra.mxu0 %v1106_v60  ;;  %v794_v10 = vmax.f32 %v538_v62, 0.0  ;;  %v796_v11 = vmax.f32 %v540_v63, 0.0  ;;  %v159_v15 = vld [vmem:[%s5467_s0 + $0x488] sm:$0xff]  ;;  %v543_v18 = vadd.f32 %v287_v13, %v31_v7  ;;  %v545_v19 = vadd.f32 %v289_v14, %v33_v8  ;;  %v161_v20 = vld [vmem:[%s5467_s0 + $0x498] sm:$0xff]  ;;  %v32_v28 = vld [vmem:[%s5467_s0 + $0x90] sm:$0xff] }
  0x19   :  { %v1109_v16 = vpack.c.bf16 %v925_v4, %v923_v3  ;;  %v922_v17 = vmax.f32 %v666_v6, 0.0  ;;  %v415_v21 = vld [vmem:[%s5468_s1 + $0x488] sm:$0xff]  ;;  %v417_v22 = vld [vmem:[%s5468_s1 + $0x498] sm:$0xff]  ;;  %1940 = vmatprep.subr.bf16.mxu1 %v1045_v9  ;;  %v924_v24 = vmax.f32 %v668_v12, 0.0  ;;  %v286_v29 = vld [vmem:[%s5468_s1 + $0x80] sm:$0xff] }
  0x1a   :  { %v1044_v23 = vpack.c.bf16 %v796_v11, %v794_v10  ;;  %v671_v25 = vadd.f32 %v415_v21, %v159_v15  ;;  %v673_v26 = vadd.f32 %v417_v22, %v161_v20  ;;  %v799_v30 = vmax.f32 %v543_v18, 0.0  ;;  %v288_v32 = vld [vmem:[%s5468_s1 + $0x90] sm:$0xff]  ;;  %v158_v34 = vld [vmem:[%s5467_s0 + $0x480] sm:$0xff]  ;;  %v35_v42 = vld [vmem:[%s5467_s0 + $0xa8] sm:$0xff] }
  0x1b   :  { %2326 = vmatprep.subr.bf16.mxu0 %v1109_v16  ;;  %v801_v31 = vmax.f32 %v545_v19, 0.0  ;;  %v542_v33 = vadd.f32 %v286_v29, %v30_v27  ;;  %v160_v35 = vld [vmem:[%s5467_s0 + $0x490] sm:$0xff]  ;;  %v1108_v36 = vpack.c.bf16 %v924_v24, %v922_v17  ;;  %v544_v39 = vadd.f32 %v288_v32, %v32_v28  ;;  %v414_v40 = vld [vmem:[%s5468_s1 + $0x480] sm:$0xff]  ;;  %v37_v47 = vld [vmem:[%s5467_s0 + $0xb8] sm:$0xff] }
  0x1c   :  { %1941 = vmatpush1.bf16.msra.mxu1 %v1044_v23  ;;  %v927_v37 = vmax.f32 %v671_v25, 0.0  ;;  %v929_v38 = vmax.f32 %v673_v26, 0.0  ;;  %v416_v41 = vld [vmem:[%s5468_s1 + $0x490] sm:$0xff]  ;;  %v670_v45 = vadd.f32 %v414_v40, %v158_v34  ;;  %v291_v48 = vld [vmem:[%s5468_s1 + $0xa8] sm:$0xff]  ;;  %v293_v49 = vld [vmem:[%s5468_s1 + $0xb8] sm:$0xff] }
  0x1d   :  { %v1047_v43 = vpack.c.bf16 %v801_v31, %v799_v30  ;;  %v798_v44 = vmax.f32 %v542_v33, 0.0  ;;  %v672_v46 = vadd.f32 %v416_v41, %v160_v35  ;;  %2327 = vmatpush1.bf16.msra.mxu0 %v1108_v36  ;;  %v800_v51 = vmax.f32 %v544_v39, 0.0  ;;  %v163_v54 = vld [vmem:[%s5467_s0 + $0x4a8] sm:$0xff]  ;;  %v165_v55 = vld [vmem:[%s5467_s0 + $0x4b8] sm:$0xff]  ;;  %v34_v61 = vld [vmem:[%s5467_s0 + $0xa0] sm:$0xff] }
  0x1e   :  { %v1111_v50 = vpack.c.bf16 %v929_v38, %v927_v37  ;;  %v547_v52 = vadd.f32 %v291_v48, %v35_v42  ;;  %v549_v53 = vadd.f32 %v293_v49, %v37_v47  ;;  %v419_v56 = vld [vmem:[%s5468_s1 + $0x4a8] sm:$0xff]  ;;  %v926_v57 = vmax.f32 %v670_v45, 0.0  ;;  %v421_v59 = vld [vmem:[%s5468_s1 + $0x4b8] sm:$0xff]  ;;  %v36_v62 = vld [vmem:[%s5467_s0 + $0xb0] sm:$0xff] }
  0x1f   :  { %1942 = vmatprep.subr.bf16.mxu1 %v1047_v43  ;;  %v928_v58 = vmax.f32 %v672_v46, 0.0  ;;  %v675_v60 = vadd.f32 %v419_v56, %v163_v54  ;;  %v1046_v63 = vpack.c.bf16 %v800_v51, %v798_v44  ;;  %v677_v2 = vadd.f32 %v421_v59, %v165_v55  ;;  %v290_v3 = vld [vmem:[%s5468_s1 + $0xa0] sm:$0xff]  ;;  %v292_v4 = vld [vmem:[%s5468_s1 + $0xb0] sm:$0xff]  ;;  %v39_v17 = vld [vmem:[%s5467_s0 + $0xc8] sm:$0xff] }
  0x20   :  { %2328 = vmatprep.subr.bf16.mxu0 %v1111_v50  ;;  %v803_v0 = vmax.f32 %v547_v52, 0.0  ;;  %v805_v1 = vmax.f32 %v549_v53, 0.0  ;;  %v162_v5 = vld [vmem:[%s5467_s0 + $0x4a0] sm:$0xff]  ;;  %v546_v8 = vadd.f32 %v290_v3, %v34_v61  ;;  %v548_v9 = vadd.f32 %v292_v4, %v36_v62  ;;  %v164_v10 = vld [vmem:[%s5467_s0 + $0x4b0] sm:$0xff]  ;;  %v41_v18 = vld [vmem:[%s5467_s0 + $0xd8] sm:$0xff] }
  0x21   :  { %v1110_v6 = vpack.c.bf16 %v928_v58, %v926_v57  ;;  %v931_v7 = vmax.f32 %v675_v60, 0.0  ;;  %v418_v11 = vld [vmem:[%s5468_s1 + $0x4a0] sm:$0xff]  ;;  %v420_v12 = vld [vmem:[%s5468_s1 + $0x4b0] sm:$0xff]  ;;  %1943 = vmatpush1.bf16.msra.mxu1 %v1046_v63  ;;  %v933_v14 = vmax.f32 %v677_v2, 0.0  ;;  %v295_v19 = vld [vmem:[%s5468_s1 + $0xc8] sm:$0xff] }
  0x22   :  { %v1049_v13 = vpack.c.bf16 %v805_v1, %v803_v0  ;;  %v674_v15 = vadd.f32 %v418_v11, %v162_v5  ;;  %v676_v16 = vadd.f32 %v420_v12, %v164_v10  ;;  %v802_v20 = vmax.f32 %v546_v8, 0.0  ;;  %v297_v22 = vld [vmem:[%s5468_s1 + $0xd8] sm:$0xff]  ;;  %v167_v24 = vld [vmem:[%s5467_s0 + $0x4c8] sm:$0xff]  ;;  %v38_v32 = vld [vmem:[%s5467_s0 + $0xc0] sm:$0xff] }
  0x23   :  { %2329 = vmatpush1.bf16.msra.mxu0 %v1110_v6  ;;  %v804_v21 = vmax.f32 %v548_v9, 0.0  ;;  %v551_v23 = vadd.f32 %v295_v19, %v39_v17  ;;  %v169_v25 = vld [vmem:[%s5467_s0 + $0x4d8] sm:$0xff]  ;;  %v1113_v26 = vpack.c.bf16 %v933_v14, %v931_v7  ;;  %v553_v29 = vadd.f32 %v297_v22, %v41_v18  ;;  %v423_v30 = vld [vmem:[%s5468_s1 + $0x4c8] sm:$0xff]  ;;  %v40_v37 = vld [vmem:[%s5467_s0 + $0xd0] sm:$0xff] }
  0x24   :  { %1944 = vmatprep.subr.bf16.mxu1 %v1049_v13  ;;  %v930_v27 = vmax.f32 %v674_v15, 0.0  ;;  %v932_v28 = vmax.f32 %v676_v16, 0.0  ;;  %v425_v31 = vld [vmem:[%s5468_s1 + $0x4d8] sm:$0xff]  ;;  %v679_v35 = vadd.f32 %v423_v30, %v167_v24  ;;  %v294_v38 = vld [vmem:[%s5468_s1 + $0xc0] sm:$0xff]  ;;  %v296_v39 = vld [vmem:[%s5468_s1 + $0xd0] sm:$0xff] }
  0x25   :  { %v1048_v33 = vpack.c.bf16 %v804_v21, %v802_v20  ;;  %v807_v34 = vmax.f32 %v551_v23, 0.0  ;;  %v681_v36 = vadd.f32 %v425_v31, %v169_v25  ;;  %2330 = vmatprep.subr.bf16.mxu0 %v1113_v26  ;;  %v809_v41 = vmax.f32 %v553_v29, 0.0  ;;  %v166_v44 = vld [vmem:[%s5467_s0 + $0x4c0] sm:$0xff]  ;;  %v168_v45 = vld [vmem:[%s5467_s0 + $0x4d0] sm:$0xff]  ;;  %v43_v51 = vld [vmem:[%s5467_s0 + $0xe8] sm:$0xff] }
  0x26   :  { %v1112_v40 = vpack.c.bf16 %v932_v28, %v930_v27  ;;  %v550_v42 = vadd.f32 %v294_v38, %v38_v32  ;;  %v552_v43 = vadd.f32 %v296_v39, %v40_v37  ;;  %v422_v46 = vld [vmem:[%s5468_s1 + $0x4c0] sm:$0xff]  ;;  %v935_v47 = vmax.f32 %v679_v35, 0.0  ;;  %v424_v49 = vld [vmem:[%s5468_s1 + $0x4d0] sm:$0xff]  ;;  %v45_v52 = vld [vmem:[%s5467_s0 + $0xf8] sm:$0xff] }
  0x27   :  { %1945 = vmatpush1.bf16.msra.mxu1 %v1048_v33  ;;  %v937_v48 = vmax.f32 %v681_v36, 0.0  ;;  %v678_v50 = vadd.f32 %v422_v46, %v166_v44  ;;  %v1051_v53 = vpack.c.bf16 %v809_v41, %v807_v34  ;;  %v680_v56 = vadd.f32 %v424_v49, %v168_v45  ;;  %v299_v57 = vld [vmem:[%s5468_s1 + $0xe8] sm:$0xff]  ;;  %v301_v58 = vld [vmem:[%s5468_s1 + $0xf8] sm:$0xff]  ;;  %v42_v7 = vld [vmem:[%s5467_s0 + $0xe0] sm:$0xff] }
  0x28   :  { %2331 = vmatpush1.bf16.msra.mxu0 %v1112_v40  ;;  %v806_v54 = vmax.f32 %v550_v42, 0.0  ;;  %v808_v55 = vmax.f32 %v552_v43, 0.0  ;;  %v171_v59 = vld [vmem:[%s5467_s0 + $0x4e8] sm:$0xff]  ;;  %v555_v62 = vadd.f32 %v299_v57, %v43_v51  ;;  %v557_v63 = vadd.f32 %v301_v58, %v45_v52  ;;  %v173_v0 = vld [vmem:[%s5467_s0 + $0x4f8] sm:$0xff]  ;;  %v44_v8 = vld [vmem:[%s5467_s0 + $0xf0] sm:$0xff] }
  0x29   :  { %v1115_v60 = vpack.c.bf16 %v937_v48, %v935_v47  ;;  %v934_v61 = vmax.f32 %v678_v50, 0.0  ;;  %v427_v1 = vld [vmem:[%s5468_s1 + $0x4e8] sm:$0xff]  ;;  %v429_v2 = vld [vmem:[%s5468_s1 + $0x4f8] sm:$0xff]  ;;  %1946 = vmatprep.subr.bf16.mxu1 %v1051_v53  ;;  %v936_v4 = vmax.f32 %v680_v56, 0.0  ;;  %v298_v9 = vld [vmem:[%s5468_s1 + $0xe0] sm:$0xff] }
  0x2a   :  { %v1050_v3 = vpack.c.bf16 %v808_v55, %v806_v54  ;;  %v683_v5 = vadd.f32 %v427_v1, %v171_v59  ;;  %v685_v6 = vadd.f32 %v429_v2, %v173_v0  ;;  %v811_v10 = vmax.f32 %v555_v62, 0.0  ;;  %v300_v12 = vld [vmem:[%s5468_s1 + $0xf0] sm:$0xff]  ;;  %v170_v14 = vld [vmem:[%s5467_s0 + $0x4e0] sm:$0xff]  ;;  %v47_v22 = vld [vmem:[%s5467_s0 + $0x108] sm:$0xff] }
  0x2b   :  { %2332 = vmatprep.subr.bf16.mxu0 %v1115_v60  ;;  %v813_v11 = vmax.f32 %v557_v63, 0.0  ;;  %v554_v13 = vadd.f32 %v298_v9, %v42_v7  ;;  %v172_v15 = vld [vmem:[%s5467_s0 + $0x4f0] sm:$0xff]  ;;  %v1114_v16 = vpack.c.bf16 %v936_v4, %v934_v61  ;;  %v556_v19 = vadd.f32 %v300_v12, %v44_v8  ;;  %v426_v20 = vld [vmem:[%s5468_s1 + $0x4e0] sm:$0xff]  ;;  %v49_v27 = vld [vmem:[%s5467_s0 + $0x118] sm:$0xff] }
  0x2c   :  { %1947 = vmatpush1.bf16.msra.mxu1 %v1050_v3  ;;  %v939_v17 = vmax.f32 %v683_v5, 0.0  ;;  %v941_v18 = vmax.f32 %v685_v6, 0.0  ;;  %v428_v21 = vld [vmem:[%s5468_s1 + $0x4f0] sm:$0xff]  ;;  %v682_v25 = vadd.f32 %v426_v20, %v170_v14  ;;  %v303_v28 = vld [vmem:[%s5468_s1 + $0x108] sm:$0xff]  ;;  %v305_v29 = vld [vmem:[%s5468_s1 + $0x118] sm:$0xff] }
  0x2d   :  { %v1053_v23 = vpack.c.bf16 %v813_v11, %v811_v10  ;;  %v810_v24 = vmax.f32 %v554_v13, 0.0  ;;  %v684_v26 = vadd.f32 %v428_v21, %v172_v15  ;;  %2333 = vmatpush1.bf16.msra.mxu0 %v1114_v16  ;;  %v812_v31 = vmax.f32 %v556_v19, 0.0  ;;  %v175_v34 = vld [vmem:[%s5467_s0 + $0x508] sm:$0xff]  ;;  %v177_v35 = vld [vmem:[%s5467_s0 + $0x518] sm:$0xff]  ;;  %v46_v41 = vld [vmem:[%s5467_s0 + $0x100] sm:$0xff] }
  0x2e   :  { %v1117_v30 = vpack.c.bf16 %v941_v18, %v939_v17  ;;  %v559_v32 = vadd.f32 %v303_v28, %v47_v22  ;;  %v561_v33 = vadd.f32 %v305_v29, %v49_v27  ;;  %v431_v36 = vld [vmem:[%s5468_s1 + $0x508] sm:$0xff]  ;;  %v938_v37 = vmax.f32 %v682_v25, 0.0  ;;  %v433_v39 = vld [vmem:[%s5468_s1 + $0x518] sm:$0xff]  ;;  %v48_v42 = vld [vmem:[%s5467_s0 + $0x110] sm:$0xff] }
  0x2f   :  { %1948 = vmatprep.subr.bf16.mxu1 %v1053_v23  ;;  %v940_v38 = vmax.f32 %v684_v26, 0.0  ;;  %v687_v40 = vadd.f32 %v431_v36, %v175_v34  ;;  %v1052_v43 = vpack.c.bf16 %v812_v31, %v810_v24  ;;  %v689_v46 = vadd.f32 %v433_v39, %v177_v35  ;;  %v302_v47 = vld [vmem:[%s5468_s1 + $0x100] sm:$0xff]  ;;  %v304_v48 = vld [vmem:[%s5468_s1 + $0x110] sm:$0xff]  ;;  %v51_v61 = vld [vmem:[%s5467_s0 + $0x128] sm:$0xff] }
  0x30   :  { %2334 = vmatprep.subr.bf16.mxu0 %v1117_v30  ;;  %v815_v44 = vmax.f32 %v559_v32, 0.0  ;;  %v817_v45 = vmax.f32 %v561_v33, 0.0  ;;  %v174_v49 = vld [vmem:[%s5467_s0 + $0x500] sm:$0xff]  ;;  %v558_v52 = vadd.f32 %v302_v47, %v46_v41  ;;  %v560_v53 = vadd.f32 %v304_v48, %v48_v42  ;;  %v176_v54 = vld [vmem:[%s5467_s0 + $0x510] sm:$0xff]  ;;  %v53_v62 = vld [vmem:[%s5467_s0 + $0x138] sm:$0xff] }
  0x31   :  { %v1116_v50 = vpack.c.bf16 %v940_v38, %v938_v37  ;;  %v943_v51 = vmax.f32 %v687_v40, 0.0  ;;  %v430_v55 = vld [vmem:[%s5468_s1 + $0x500] sm:$0xff]  ;;  %v432_v56 = vld [vmem:[%s5468_s1 + $0x510] sm:$0xff]  ;;  %1949 = vmatpush1.bf16.msra.mxu1 %v1052_v43  ;;  %v945_v58 = vmax.f32 %v689_v46, 0.0  ;;  %v307_v63 = vld [vmem:[%s5468_s1 + $0x128] sm:$0xff] }
  0x32   :  { %v1055_v57 = vpack.c.bf16 %v817_v45, %v815_v44  ;;  %v686_v59 = vadd.f32 %v430_v55, %v174_v49  ;;  %v688_v60 = vadd.f32 %v432_v56, %v176_v54  ;;  %v814_v0 = vmax.f32 %v558_v52, 0.0  ;;  %v309_v2 = vld [vmem:[%s5468_s1 + $0x138] sm:$0xff]  ;;  %v179_v4 = vld [vmem:[%s5467_s0 + $0x528] sm:$0xff]  ;;  %v50_v12 = vld [vmem:[%s5467_s0 + $0x120] sm:$0xff] }
  0x33   :  { %2335 = vmatpush1.bf16.msra.mxu0 %v1116_v50  ;;  %v816_v1 = vmax.f32 %v560_v53, 0.0  ;;  %v563_v3 = vadd.f32 %v307_v63, %v51_v61  ;;  %v181_v5 = vld [vmem:[%s5467_s0 + $0x538] sm:$0xff]  ;;  %v1119_v6 = vpack.c.bf16 %v945_v58, %v943_v51  ;;  %v565_v9 = vadd.f32 %v309_v2, %v53_v62  ;;  %v435_v10 = vld [vmem:[%s5468_s1 + $0x528] sm:$0xff]  ;;  %v52_v17 = vld [vmem:[%s5467_s0 + $0x130] sm:$0xff] }
  0x34   :  { %1950 = vmatprep.subr.bf16.mxu1 %v1055_v57  ;;  %v942_v7 = vmax.f32 %v686_v59, 0.0  ;;  %v944_v8 = vmax.f32 %v688_v60, 0.0  ;;  %v437_v11 = vld [vmem:[%s5468_s1 + $0x538] sm:$0xff]  ;;  %v691_v15 = vadd.f32 %v435_v10, %v179_v4  ;;  %v306_v18 = vld [vmem:[%s5468_s1 + $0x120] sm:$0xff]  ;;  %v308_v19 = vld [vmem:[%s5468_s1 + $0x130] sm:$0xff] }
  0x35   :  { %v1054_v13 = vpack.c.bf16 %v816_v1, %v814_v0  ;;  %v819_v14 = vmax.f32 %v563_v3, 0.0  ;;  %v693_v16 = vadd.f32 %v437_v11, %v181_v5  ;;  %2336 = vmatprep.subr.bf16.mxu0 %v1119_v6  ;;  %v821_v21 = vmax.f32 %v565_v9, 0.0  ;;  %v178_v24 = vld [vmem:[%s5467_s0 + $0x520] sm:$0xff]  ;;  %v180_v25 = vld [vmem:[%s5467_s0 + $0x530] sm:$0xff]  ;;  %v55_v31 = vld [vmem:[%s5467_s0 + $0x148] sm:$0xff] }
  0x36   :  { %v1118_v20 = vpack.c.bf16 %v944_v8, %v942_v7  ;;  %v562_v22 = vadd.f32 %v306_v18, %v50_v12  ;;  %v564_v23 = vadd.f32 %v308_v19, %v52_v17  ;;  %v434_v26 = vld [vmem:[%s5468_s1 + $0x520] sm:$0xff]  ;;  %v947_v27 = vmax.f32 %v691_v15, 0.0  ;;  %v436_v29 = vld [vmem:[%s5468_s1 + $0x530] sm:$0xff]  ;;  %v57_v32 = vld [vmem:[%s5467_s0 + $0x158] sm:$0xff] }
  0x37   :  { %1951 = vmatpush1.bf16.msra.mxu1 %v1054_v13  ;;  %v949_v28 = vmax.f32 %v693_v16, 0.0  ;;  %v690_v30 = vadd.f32 %v434_v26, %v178_v24  ;;  %v1057_v33 = vpack.c.bf16 %v821_v21, %v819_v14  ;;  %v692_v36 = vadd.f32 %v436_v29, %v180_v25  ;;  %v311_v37 = vld [vmem:[%s5468_s1 + $0x148] sm:$0xff]  ;;  %v313_v38 = vld [vmem:[%s5468_s1 + $0x158] sm:$0xff]  ;;  %v54_v51 = vld [vmem:[%s5467_s0 + $0x140] sm:$0xff] }
  0x38   :  { %2337 = vmatpush1.bf16.msra.mxu0 %v1118_v20  ;;  %v818_v34 = vmax.f32 %v562_v22, 0.0  ;;  %v820_v35 = vmax.f32 %v564_v23, 0.0  ;;  %v183_v39 = vld [vmem:[%s5467_s0 + $0x548] sm:$0xff]  ;;  %v567_v42 = vadd.f32 %v311_v37, %v55_v31  ;;  %v569_v43 = vadd.f32 %v313_v38, %v57_v32  ;;  %v185_v44 = vld [vmem:[%s5467_s0 + $0x558] sm:$0xff]  ;;  %v56_v52 = vld [vmem:[%s5467_s0 + $0x150] sm:$0xff] }
  0x39   :  { %v1121_v40 = vpack.c.bf16 %v949_v28, %v947_v27  ;;  %v946_v41 = vmax.f32 %v690_v30, 0.0  ;;  %v439_v45 = vld [vmem:[%s5468_s1 + $0x548] sm:$0xff]  ;;  %v441_v46 = vld [vmem:[%s5468_s1 + $0x558] sm:$0xff]  ;;  %1952 = vmatprep.subr.bf16.mxu1 %v1057_v33  ;;  %v948_v48 = vmax.f32 %v692_v36, 0.0  ;;  %v310_v53 = vld [vmem:[%s5468_s1 + $0x140] sm:$0xff] }
  0x3a   :  { %v1056_v47 = vpack.c.bf16 %v820_v35, %v818_v34  ;;  %v695_v49 = vadd.f32 %v439_v45, %v183_v39  ;;  %v697_v50 = vadd.f32 %v441_v46, %v185_v44  ;;  %v823_v54 = vmax.f32 %v567_v42, 0.0  ;;  %v312_v56 = vld [vmem:[%s5468_s1 + $0x150] sm:$0xff]  ;;  %v182_v58 = vld [vmem:[%s5467_s0 + $0x540] sm:$0xff]  ;;  %v59_v2 = vld [vmem:[%s5467_s0 + $0x168] sm:$0xff] }
  0x3b   :  { %2338 = vmatprep.subr.bf16.mxu0 %v1121_v40  ;;  %v825_v55 = vmax.f32 %v569_v43, 0.0  ;;  %v566_v57 = vadd.f32 %v310_v53, %v54_v51  ;;  %v184_v59 = vld [vmem:[%s5467_s0 + $0x550] sm:$0xff]  ;;  %v1120_v60 = vpack.c.bf16 %v948_v48, %v946_v41  ;;  %v568_v63 = vadd.f32 %v312_v56, %v56_v52  ;;  %v438_v0 = vld [vmem:[%s5468_s1 + $0x540] sm:$0xff]  ;;  %v61_v7 = vld [vmem:[%s5467_s0 + $0x178] sm:$0xff] }
  0x3c   :  { %1953 = vmatpush1.bf16.msra.mxu1 %v1056_v47  ;;  %v951_v61 = vmax.f32 %v695_v49, 0.0  ;;  %v953_v62 = vmax.f32 %v697_v50, 0.0  ;;  %v440_v1 = vld [vmem:[%s5468_s1 + $0x550] sm:$0xff]  ;;  %v694_v5 = vadd.f32 %v438_v0, %v182_v58  ;;  %v315_v8 = vld [vmem:[%s5468_s1 + $0x168] sm:$0xff]  ;;  %v317_v9 = vld [vmem:[%s5468_s1 + $0x178] sm:$0xff] }
  0x3d   :  { %v1059_v3 = vpack.c.bf16 %v825_v55, %v823_v54  ;;  %v822_v4 = vmax.f32 %v566_v57, 0.0  ;;  %v696_v6 = vadd.f32 %v440_v1, %v184_v59  ;;  %2339 = vmatpush1.bf16.msra.mxu0 %v1120_v60  ;;  %v824_v11 = vmax.f32 %v568_v63, 0.0  ;;  %v187_v14 = vld [vmem:[%s5467_s0 + $0x568] sm:$0xff]  ;;  %v189_v15 = vld [vmem:[%s5467_s0 + $0x578] sm:$0xff]  ;;  %v58_v21 = vld [vmem:[%s5467_s0 + $0x160] sm:$0xff] }
  0x3e   :  { %v1123_v10 = vpack.c.bf16 %v953_v62, %v951_v61  ;;  %v571_v12 = vadd.f32 %v315_v8, %v59_v2  ;;  %v573_v13 = vadd.f32 %v317_v9, %v61_v7  ;;  %v443_v16 = vld [vmem:[%s5468_s1 + $0x568] sm:$0xff]  ;;  %v950_v17 = vmax.f32 %v694_v5, 0.0  ;;  %v445_v19 = vld [vmem:[%s5468_s1 + $0x578] sm:$0xff]  ;;  %v60_v22 = vld [vmem:[%s5467_s0 + $0x170] sm:$0xff] }
  0x3f   :  { %1954 = vmatprep.subr.bf16.mxu1 %v1059_v3  ;;  %v952_v18 = vmax.f32 %v696_v6, 0.0  ;;  %v699_v20 = vadd.f32 %v443_v16, %v187_v14  ;;  %v1058_v23 = vpack.c.bf16 %v824_v11, %v822_v4  ;;  %v701_v26 = vadd.f32 %v445_v19, %v189_v15  ;;  %v314_v27 = vld [vmem:[%s5468_s1 + $0x160] sm:$0xff]  ;;  %v316_v28 = vld [vmem:[%s5468_s1 + $0x170] sm:$0xff]  ;;  %v63_v41 = vld [vmem:[%s5467_s0 + $0x188] sm:$0xff] }
  0x40   :  { %2340 = vmatprep.subr.bf16.mxu0 %v1123_v10  ;;  %v827_v24 = vmax.f32 %v571_v12, 0.0  ;;  %v829_v25 = vmax.f32 %v573_v13, 0.0  ;;  %v186_v29 = vld [vmem:[%s5467_s0 + $0x560] sm:$0xff]  ;;  %v570_v32 = vadd.f32 %v314_v27, %v58_v21  ;;  %v572_v33 = vadd.f32 %v316_v28, %v60_v22  ;;  %v188_v34 = vld [vmem:[%s5467_s0 + $0x570] sm:$0xff]  ;;  %v65_v42 = vld [vmem:[%s5467_s0 + $0x198] sm:$0xff] }
  0x41   :  { %v1122_v30 = vpack.c.bf16 %v952_v18, %v950_v17  ;;  %v955_v31 = vmax.f32 %v699_v20, 0.0  ;;  %v442_v35 = vld [vmem:[%s5468_s1 + $0x560] sm:$0xff]  ;;  %v444_v36 = vld [vmem:[%s5468_s1 + $0x570] sm:$0xff]  ;;  %1955 = vmatpush1.bf16.msra.mxu1 %v1058_v23  ;;  %v957_v38 = vmax.f32 %v701_v26, 0.0  ;;  %v319_v43 = vld [vmem:[%s5468_s1 + $0x188] sm:$0xff] }
  0x42   :  { %v1061_v37 = vpack.c.bf16 %v829_v25, %v827_v24  ;;  %v698_v39 = vadd.f32 %v442_v35, %v186_v29  ;;  %v700_v40 = vadd.f32 %v444_v36, %v188_v34  ;;  %v826_v44 = vmax.f32 %v570_v32, 0.0  ;;  %v321_v46 = vld [vmem:[%s5468_s1 + $0x198] sm:$0xff]  ;;  %v191_v48 = vld [vmem:[%s5467_s0 + $0x588] sm:$0xff]  ;;  %v62_v56 = vld [vmem:[%s5467_s0 + $0x180] sm:$0xff] }
  0x43   :  { %2341 = vmatpush1.bf16.msra.mxu0 %v1122_v30  ;;  %v828_v45 = vmax.f32 %v572_v33, 0.0  ;;  %v575_v47 = vadd.f32 %v319_v43, %v63_v41  ;;  %v193_v49 = vld [vmem:[%s5467_s0 + $0x598] sm:$0xff]  ;;  %v1125_v50 = vpack.c.bf16 %v957_v38, %v955_v31  ;;  %v577_v53 = vadd.f32 %v321_v46, %v65_v42  ;;  %v447_v54 = vld [vmem:[%s5468_s1 + $0x588] sm:$0xff]  ;;  %v64_v61 = vld [vmem:[%s5467_s0 + $0x190] sm:$0xff] }
  0x44   :  { %1956 = vmatprep.subr.bf16.mxu1 %v1061_v37  ;;  %v954_v51 = vmax.f32 %v698_v39, 0.0  ;;  %v956_v52 = vmax.f32 %v700_v40, 0.0  ;;  %v449_v55 = vld [vmem:[%s5468_s1 + $0x598] sm:$0xff]  ;;  %v703_v59 = vadd.f32 %v447_v54, %v191_v48  ;;  %v318_v62 = vld [vmem:[%s5468_s1 + $0x180] sm:$0xff]  ;;  %v320_v63 = vld [vmem:[%s5468_s1 + $0x190] sm:$0xff] }
  0x45   :  { %v1060_v57 = vpack.c.bf16 %v828_v45, %v826_v44  ;;  %v831_v58 = vmax.f32 %v575_v47, 0.0  ;;  %v705_v60 = vadd.f32 %v449_v55, %v193_v49  ;;  %2342 = vmatprep.subr.bf16.mxu0 %v1125_v50  ;;  %v833_v1 = vmax.f32 %v577_v53, 0.0  ;;  %v190_v4 = vld [vmem:[%s5467_s0 + $0x580] sm:$0xff]  ;;  %v192_v5 = vld [vmem:[%s5467_s0 + $0x590] sm:$0xff]  ;;  %v67_v11 = vld [vmem:[%s5467_s0 + $0x1a8] sm:$0xff] }
  0x46   :  { %v1124_v0 = vpack.c.bf16 %v956_v52, %v954_v51  ;;  %v574_v2 = vadd.f32 %v318_v62, %v62_v56  ;;  %v576_v3 = vadd.f32 %v320_v63, %v64_v61  ;;  %v446_v6 = vld [vmem:[%s5468_s1 + $0x580] sm:$0xff]  ;;  %v959_v7 = vmax.f32 %v703_v59, 0.0  ;;  %v448_v9 = vld [vmem:[%s5468_s1 + $0x590] sm:$0xff]  ;;  %v69_v12 = vld [vmem:[%s5467_s0 + $0x1b8] sm:$0xff] }
  0x47   :  { %1957 = vmatpush1.bf16.msra.mxu1 %v1060_v57  ;;  %v961_v8 = vmax.f32 %v705_v60, 0.0  ;;  %v702_v10 = vadd.f32 %v446_v6, %v190_v4  ;;  %v1063_v13 = vpack.c.bf16 %v833_v1, %v831_v58  ;;  %v704_v16 = vadd.f32 %v448_v9, %v192_v5  ;;  %v323_v17 = vld [vmem:[%s5468_s1 + $0x1a8] sm:$0xff]  ;;  %v325_v18 = vld [vmem:[%s5468_s1 + $0x1b8] sm:$0xff]  ;;  %v66_v31 = vld [vmem:[%s5467_s0 + $0x1a0] sm:$0xff] }
  0x48   :  { %2343 = vmatpush1.bf16.msra.mxu0 %v1124_v0  ;;  %v830_v14 = vmax.f32 %v574_v2, 0.0  ;;  %v832_v15 = vmax.f32 %v576_v3, 0.0  ;;  %v195_v19 = vld [vmem:[%s5467_s0 + $0x5a8] sm:$0xff]  ;;  %v579_v22 = vadd.f32 %v323_v17, %v67_v11  ;;  %v581_v23 = vadd.f32 %v325_v18, %v69_v12  ;;  %v197_v24 = vld [vmem:[%s5467_s0 + $0x5b8] sm:$0xff]  ;;  %v68_v32 = vld [vmem:[%s5467_s0 + $0x1b0] sm:$0xff] }
  0x49   :  { %v1127_v20 = vpack.c.bf16 %v961_v8, %v959_v7  ;;  %v958_v21 = vmax.f32 %v702_v10, 0.0  ;;  %v451_v25 = vld [vmem:[%s5468_s1 + $0x5a8] sm:$0xff]  ;;  %v453_v26 = vld [vmem:[%s5468_s1 + $0x5b8] sm:$0xff]  ;;  %1958 = vmatprep.subr.bf16.mxu1 %v1063_v13  ;;  %v960_v28 = vmax.f32 %v704_v16, 0.0  ;;  %v322_v33 = vld [vmem:[%s5468_s1 + $0x1a0] sm:$0xff] }
  0x4a   :  { %v1062_v27 = vpack.c.bf16 %v832_v15, %v830_v14  ;;  %v707_v29 = vadd.f32 %v451_v25, %v195_v19  ;;  %v709_v30 = vadd.f32 %v453_v26, %v197_v24  ;;  %v835_v34 = vmax.f32 %v579_v22, 0.0  ;;  %v324_v36 = vld [vmem:[%s5468_s1 + $0x1b0] sm:$0xff]  ;;  %v194_v38 = vld [vmem:[%s5467_s0 + $0x5a0] sm:$0xff]  ;;  %v71_v46 = vld [vmem:[%s5467_s0 + $0x1c8] sm:$0xff] }
  0x4b   :  { %2344 = vmatprep.subr.bf16.mxu0 %v1127_v20  ;;  %v837_v35 = vmax.f32 %v581_v23, 0.0  ;;  %v578_v37 = vadd.f32 %v322_v33, %v66_v31  ;;  %v196_v39 = vld [vmem:[%s5467_s0 + $0x5b0] sm:$0xff]  ;;  %v1126_v40 = vpack.c.bf16 %v960_v28, %v958_v21  ;;  %v580_v43 = vadd.f32 %v324_v36, %v68_v32  ;;  %v450_v44 = vld [vmem:[%s5468_s1 + $0x5a0] sm:$0xff]  ;;  %v73_v51 = vld [vmem:[%s5467_s0 + $0x1d8] sm:$0xff] }
  0x4c   :  { %1959 = vmatpush1.bf16.msra.mxu1 %v1062_v27  ;;  %v963_v41 = vmax.f32 %v707_v29, 0.0  ;;  %v965_v42 = vmax.f32 %v709_v30, 0.0  ;;  %v452_v45 = vld [vmem:[%s5468_s1 + $0x5b0] sm:$0xff]  ;;  %v706_v49 = vadd.f32 %v450_v44, %v194_v38  ;;  %v327_v52 = vld [vmem:[%s5468_s1 + $0x1c8] sm:$0xff]  ;;  %v329_v53 = vld [vmem:[%s5468_s1 + $0x1d8] sm:$0xff] }
  0x4d   :  { %v1065_v47 = vpack.c.bf16 %v837_v35, %v835_v34  ;;  %v834_v48 = vmax.f32 %v578_v37, 0.0  ;;  %v708_v50 = vadd.f32 %v452_v45, %v196_v39  ;;  %2345 = vmatpush1.bf16.msra.mxu0 %v1126_v40  ;;  %v836_v55 = vmax.f32 %v580_v43, 0.0  ;;  %v199_v58 = vld [vmem:[%s5467_s0 + $0x5c8] sm:$0xff]  ;;  %v201_v59 = vld [vmem:[%s5467_s0 + $0x5d8] sm:$0xff]  ;;  %v70_v1 = vld [vmem:[%s5467_s0 + $0x1c0] sm:$0xff] }
  0x4e   :  { %v1129_v54 = vpack.c.bf16 %v965_v42, %v963_v41  ;;  %v583_v56 = vadd.f32 %v327_v52, %v71_v46  ;;  %v585_v57 = vadd.f32 %v329_v53, %v73_v51  ;;  %v455_v60 = vld [vmem:[%s5468_s1 + $0x5c8] sm:$0xff]  ;;  %v962_v61 = vmax.f32 %v706_v49, 0.0  ;;  %v457_v63 = vld [vmem:[%s5468_s1 + $0x5d8] sm:$0xff]  ;;  %v72_v2 = vld [vmem:[%s5467_s0 + $0x1d0] sm:$0xff] }
  0x4f   :  { %1960 = vmatprep.subr.bf16.mxu1 %v1065_v47  ;;  %v964_v62 = vmax.f32 %v708_v50, 0.0  ;;  %v711_v0 = vadd.f32 %v455_v60, %v199_v58  ;;  %v1064_v3 = vpack.c.bf16 %v836_v55, %v834_v48  ;;  %v713_v6 = vadd.f32 %v457_v63, %v201_v59  ;;  %v326_v7 = vld [vmem:[%s5468_s1 + $0x1c0] sm:$0xff]  ;;  %v328_v8 = vld [vmem:[%s5468_s1 + $0x1d0] sm:$0xff]  ;;  %v75_v21 = vld [vmem:[%s5467_s0 + $0x1e8] sm:$0xff] }
  0x50   :  { %2346 = vmatprep.subr.bf16.mxu0 %v1129_v54  ;;  %v839_v4 = vmax.f32 %v583_v56, 0.0  ;;  %v841_v5 = vmax.f32 %v585_v57, 0.0  ;;  %v198_v9 = vld [vmem:[%s5467_s0 + $0x5c0] sm:$0xff]  ;;  %v582_v12 = vadd.f32 %v326_v7, %v70_v1  ;;  %v584_v13 = vadd.f32 %v328_v8, %v72_v2  ;;  %v200_v14 = vld [vmem:[%s5467_s0 + $0x5d0] sm:$0xff]  ;;  %v77_v22 = vld [vmem:[%s5467_s0 + $0x1f8] sm:$0xff] }
  0x51   :  { %v1128_v10 = vpack.c.bf16 %v964_v62, %v962_v61  ;;  %v967_v11 = vmax.f32 %v711_v0, 0.0  ;;  %v454_v15 = vld [vmem:[%s5468_s1 + $0x5c0] sm:$0xff]  ;;  %v456_v16 = vld [vmem:[%s5468_s1 + $0x5d0] sm:$0xff]  ;;  %1961 = vmatpush1.bf16.msra.mxu1 %v1064_v3  ;;  %v969_v18 = vmax.f32 %v713_v6, 0.0  ;;  %v331_v23 = vld [vmem:[%s5468_s1 + $0x1e8] sm:$0xff] }
  0x52   :  { %v1067_v17 = vpack.c.bf16 %v841_v5, %v839_v4  ;;  %v710_v19 = vadd.f32 %v454_v15, %v198_v9  ;;  %v712_v20 = vadd.f32 %v456_v16, %v200_v14  ;;  %v838_v24 = vmax.f32 %v582_v12, 0.0  ;;  %v333_v26 = vld [vmem:[%s5468_s1 + $0x1f8] sm:$0xff]  ;;  %v203_v28 = vld [vmem:[%s5467_s0 + $0x5e8] sm:$0xff]  ;;  %v74_v36 = vld [vmem:[%s5467_s0 + $0x1e0] sm:$0xff] }
  0x53   :  { %2347 = vmatpush1.bf16.msra.mxu0 %v1128_v10  ;;  %v840_v25 = vmax.f32 %v584_v13, 0.0  ;;  %v587_v27 = vadd.f32 %v331_v23, %v75_v21  ;;  %v205_v29 = vld [vmem:[%s5467_s0 + $0x5f8] sm:$0xff]  ;;  %v1131_v30 = vpack.c.bf16 %v969_v18, %v967_v11  ;;  %v589_v33 = vadd.f32 %v333_v26, %v77_v22  ;;  %v459_v34 = vld [vmem:[%s5468_s1 + $0x5e8] sm:$0xff]  ;;  %v76_v41 = vld [vmem:[%s5467_s0 + $0x1f0] sm:$0xff] }
  0x54   :  { %1962 = vmatprep.subr.bf16.mxu1 %v1067_v17  ;;  %v966_v31 = vmax.f32 %v710_v19, 0.0  ;;  %v968_v32 = vmax.f32 %v712_v20, 0.0  ;;  %v461_v35 = vld [vmem:[%s5468_s1 + $0x5f8] sm:$0xff]  ;;  %v715_v39 = vadd.f32 %v459_v34, %v203_v28  ;;  %v330_v42 = vld [vmem:[%s5468_s1 + $0x1e0] sm:$0xff]  ;;  %v332_v43 = vld [vmem:[%s5468_s1 + $0x1f0] sm:$0xff] }
  0x55   :  { %v1066_v37 = vpack.c.bf16 %v840_v25, %v838_v24  ;;  %v843_v38 = vmax.f32 %v587_v27, 0.0  ;;  %v717_v40 = vadd.f32 %v461_v35, %v205_v29  ;;  %2348 = vmatprep.subr.bf16.mxu0 %v1131_v30  ;;  %v845_v45 = vmax.f32 %v589_v33, 0.0  ;;  %v202_v48 = vld [vmem:[%s5467_s0 + $0x5e0] sm:$0xff]  ;;  %v204_v49 = vld [vmem:[%s5467_s0 + $0x5f0] sm:$0xff]  ;;  %v79_v63 = vld [vmem:[%s5467_s0 + $0x208] sm:$0xff] }
  0x56   :  { %v1130_v44 = vpack.c.bf16 %v968_v32, %v966_v31  ;;  %v586_v46 = vadd.f32 %v330_v42, %v74_v36  ;;  %v588_v47 = vadd.f32 %v332_v43, %v76_v41  ;;  %v458_v50 = vld [vmem:[%s5468_s1 + $0x5e0] sm:$0xff]  ;;  %v971_v51 = vmax.f32 %v715_v39, 0.0  ;;  %v460_v53 = vld [vmem:[%s5468_s1 + $0x5f0] sm:$0xff]  ;;  %v81_v3 = vld [vmem:[%s5467_s0 + $0x218] sm:$0xff] }
  0x57   :  { %1963 = vmatpush1.bf16.msra.mxu1 %v1066_v37  ;;  %v973_v52 = vmax.f32 %v717_v40, 0.0  ;;  %v714_v54 = vadd.f32 %v458_v50, %v202_v48  ;;  %v1166_v55 = vld [vmem:[%s5469_s2] sm:$0xff]  ;;  %v1069_v57 = vpack.c.bf16 %v845_v45, %v843_v38  ;;  %v716_v60 = vadd.f32 %v460_v53, %v204_v49  ;;  %v3892_v61 = vld [vmem:[%s5469_s2 + $0x10] sm:$0xff]  ;;  %v335_v4 = vld [vmem:[%s5468_s1 + $0x208] sm:$0xff] }
  0x58   :  { %v1170_v56 = vld [vmem:[%s5469_s2 + $0x20] sm:$0xff]  ;;  %2349 = vmatpush1.bf16.msra.mxu0 %v1130_v44  ;;  %v842_v58 = vmax.f32 %v586_v46, 0.0  ;;  %v844_v59 = vmax.f32 %v588_v47, 0.0  ;;  %v1172_v62 = vld [vmem:[%s5469_s2 + $0x30] sm:$0xff]  ;;  %v337_v5 = vld [vmem:[%s5468_s1 + $0x218] sm:$0xff]  ;;  %v591_v13 = vadd.f32 %v335_v4, %v79_v63 }
  0x59   :  { %v1133_v0 = vpack.c.bf16 %v973_v52, %v971_v51  ;;  %v970_v1 = vmax.f32 %v714_v54, 0.0  ;;  %v2776_v2 = vcombine.high %v1166_v55, %v1170_v56  ;;  %1964 = vmatprep.subr.bf16.mxu1 %v1069_v57  ;;  %v972_v7 = vmax.f32 %v716_v60, 0.0  ;;  %v207_v10 = vld [vmem:[%s5467_s0 + $0x608] sm:$0xff]  ;;  %v209_v11 = vld [vmem:[%s5467_s0 + $0x618] sm:$0xff]  ;;  %v78_v17 = vld [vmem:[%s5467_s0 + $0x200] sm:$0xff] }
  0x5a   :  { %v1068_v6 = vpack.c.bf16 %v844_v59, %v842_v58  ;;  %v2775_v8 = vcombine.low %v1166_v55, %v1170_v56  ;;  %v2780_v9 = vcombine.high %v3892_v61, %v1172_v62  ;;  %v463_v12 = vld [vmem:[%s5468_s1 + $0x608] sm:$0xff]  ;;  %v593_v14 = vadd.f32 %v337_v5, %v81_v3  ;;  %v465_v15 = vld [vmem:[%s5468_s1 + $0x618] sm:$0xff]  ;;  %v80_v18 = vld [vmem:[%s5467_s0 + $0x210] sm:$0xff] }
  0x5b   :  { %2350 = vmatprep.subr.bf16.mxu0 %v1133_v0  ;;  %1966 = vmatprep.mubr.bf16.mxu1 %v2776_v2  ;;  %v719_v16 = vadd.f32 %v463_v12, %v207_v10  ;;  %v1132_v19 = vpack.c.bf16 %v972_v7, %v970_v1  ;;  %v2779_v20 = vcombine.low %v3892_v61, %v1172_v62  ;;  %v334_v22 = vld [vmem:[%s5468_s1 + $0x200] sm:$0xff]  ;;  %v336_v23 = vld [vmem:[%s5468_s1 + $0x210] sm:$0xff]  ;;  %v847_v25 = vmax.f32 %v591_v13, 0.0  ;;  %v83_v43 = vld [vmem:[%s5467_s0 + $0x228] sm:$0xff] }
  0x5c   :  { %1965 = vmatpush1.bf16.msra.mxu1 %v1068_v6  ;;  %2352 = vmatprep.mubr.bf16.mxu0 %v2780_v9  ;;  %v721_v21 = vadd.f32 %v465_v15, %v209_v11  ;;  %v206_v24 = vld [vmem:[%s5467_s0 + $0x600] sm:$0xff]  ;;  %v849_v26 = vmax.f32 %v593_v14, 0.0  ;;  %v590_v28 = vadd.f32 %v334_v22, %v78_v17  ;;  %v208_v29 = vld [vmem:[%s5467_s0 + $0x610] sm:$0xff]  ;;  %v592_v33 = vadd.f32 %v336_v23, %v80_v18  ;;  %v85_v44 = vld [vmem:[%s5467_s0 + $0x238] sm:$0xff] }
  0x5d   :  { %v975_v27 = vmax.f32 %v719_v16, 0.0  ;;  %v462_v30 = vld [vmem:[%s5468_s1 + $0x600] sm:$0xff]  ;;  %v464_v31 = vld [vmem:[%s5468_s1 + $0x610] sm:$0xff]  ;;  %2351 = vmatpush1.bf16.msra.mxu0 %v1132_v19  ;;  %v339_v49 = vld [vmem:[%s5468_s1 + $0x228] sm:$0xff] }
  0x5e   :  { %v977_v32 = vmax.f32 %v721_v21, 0.0  ;;  %v718_v34 = vadd.f32 %v462_v30, %v206_v24  ;;  %v720_v35 = vadd.f32 %v464_v31, %v208_v29  ;;  %v3950_v36 = vld [vmem:[%s5469_s2 + $0x40] sm:$0xff]  ;;  %v3958_v38 = vld [vmem:[%s5469_s2 + $0x50] sm:$0xff]  ;;  %v1071_v39 = vpack.c.bf16 %v849_v26, %v847_v25  ;;  %v341_v50 = vld [vmem:[%s5468_s1 + $0x238] sm:$0xff] }
  0x5f   :  { %v1178_v37 = vld [vmem:[%s5469_s2 + $0x60] sm:$0xff]  ;;  %1967 = vmatmul.mubr.bf16.vlgmr.msra.gmra.mrb[0].mxu1 %v2775_v8  ;;  %v846_v40 = vmax.f32 %v590_v28, 0.0  ;;  %v3964_v42 = vld [vmem:[%s5469_s2 + $0x70] sm:$0xff]  ;;  %v848_v46 = vmax.f32 %v592_v33, 0.0  ;;  %v211_v51 = vld [vmem:[%s5467_s0 + $0x628] sm:$0xff]  ;;  %v595_v53 = vadd.f32 %v339_v49, %v83_v43  ;;  %v597_v54 = vadd.f32 %v341_v50, %v85_v44 }
  0x60   :  { %v2784_v41 = vcombine.high %v3950_v36, %v1178_v37  ;;  %v1135_v45 = vpack.c.bf16 %v977_v32, %v975_v27  ;;  %v974_v47 = vmax.f32 %v718_v34, 0.0  ;;  %v976_v48 = vmax.f32 %v720_v35, 0.0  ;;  %2127 = vmatprep.subr.bf16.mxu1 %v1071_v39  ;;  %2353 = vmatmul.mubr.bf16.vlgmr.msra.gmra.mrb[0].mxu0 %v2779_v20  ;;  %v213_v55 = vld [vmem:[%s5467_s0 + $0x638] sm:$0xff]  ;;  %v467_v56 = vld [vmem:[%s5468_s1 + $0x628] sm:$0xff]  ;;  %v82_v61 = vld [vmem:[%s5467_s0 + $0x220] sm:$0xff] }
  0x61   :  { %v2788_v52 = vcombine.high %v3958_v38, %v3964_v42  ;;  %v469_v57 = vld [vmem:[%s5468_s1 + $0x638] sm:$0xff]  ;;  %v1070_v58 = vpack.c.bf16 %v848_v46, %v846_v40  ;;  %v2783_v60 = vcombine.low %v3950_v36, %v1178_v37  ;;  %v84_v62 = vld [vmem:[%s5467_s0 + $0x230] sm:$0xff]  ;;  %v338_v63 = vld [vmem:[%s5468_s1 + $0x220] sm:$0xff]  ;;  %v851_v0 = vmax.f32 %v595_v53, 0.0 }
  0x62   :  { %2513 = vmatprep.subr.bf16.mxu0 %v1135_v45  ;;  %v1134_v59 = vpack.c.bf16 %v976_v48, %v974_v47  ;;  %1976 = vmatprep.mubr.bf16.mxu1 %v2784_v41  ;;  %v853_v1 = vmax.f32 %v597_v54, 0.0  ;;  %v723_v2 = vadd.f32 %v467_v56, %v211_v51  ;;  %v725_v3 = vadd.f32 %v469_v57, %v213_v55  ;;  %v340_v4 = vld [vmem:[%s5468_s1 + $0x230] sm:$0xff]  ;;  %v210_v5 = vld [vmem:[%s5467_s0 + $0x620] sm:$0xff]  ;;  %v87_v24 = vld [vmem:[%s5467_s0 + $0x248] sm:$0xff] }
  0x63   :  { %2362 = vmatprep.mubr.bf16.mxu0 %v2788_v52  ;;  %v212_v6 = vld [vmem:[%s5467_s0 + $0x630] sm:$0xff]  ;;  %2128 = vmatpush1.bf16.msra.mxu1 %v1070_v58  ;;  %v2787_v7 = vcombine.low %v3958_v38, %v3964_v42  ;;  %v594_v8 = vadd.f32 %v338_v63, %v82_v61  ;;  %v596_v9 = vadd.f32 %v340_v4, %v84_v62  ;;  %v466_v10 = vld [vmem:[%s5468_s1 + $0x620] sm:$0xff]  ;;  %v89_v25 = vld [vmem:[%s5467_s0 + $0x258] sm:$0xff] }
  0x64   :  { %2514 = vmatpush1.bf16.msra.mxu0 %v1134_v59  ;;  %v468_v11 = vld [vmem:[%s5468_s1 + $0x630] sm:$0xff]  ;;  %v4022_v12 = vld [vmem:[%s5469_s2 + $0x80] sm:$0xff]  ;;  %v1073_v13 = vpack.c.bf16 %v853_v1, %v851_v0  ;;  %v979_v14 = vmax.f32 %v723_v2, 0.0  ;;  %v981_v15 = vmax.f32 %v725_v3, 0.0  ;;  %v722_v16 = vadd.f32 %v466_v10, %v210_v5  ;;  %v343_v26 = vld [vmem:[%s5468_s1 + $0x248] sm:$0xff] }
  0x65   :  { %v4027_v17 = vld [vmem:[%s5469_s2 + $0xa0] sm:$0xff]  ;;  %v4032_v18 = vld [vmem:[%s5469_s2 + $0x90] sm:$0xff]  ;;  %v850_v20 = vmax.f32 %v594_v8, 0.0  ;;  %v852_v21 = vmax.f32 %v596_v9, 0.0  ;;  %v724_v22 = vadd.f32 %v468_v11, %v212_v6  ;;  %v345_v30 = vld [vmem:[%s5468_s1 + $0x258] sm:$0xff]  ;;  %v599_v35 = vadd.f32 %v343_v26, %v87_v24 }
  0x66   :  { %v4037_v19 = vld [vmem:[%s5469_s2 + $0xb0] sm:$0xff]  ;;  %v2792_v23 = vcombine.high %v4022_v12, %v4027_v17  ;;  %2129 = vmatprep.subr.bf16.mxu1 %v1073_v13  ;;  %v1137_v27 = vpack.c.bf16 %v981_v15, %v979_v14  ;;  %v978_v28 = vmax.f32 %v722_v16, 0.0  ;;  %v215_v31 = vld [vmem:[%s5467_s0 + $0x648] sm:$0xff]  ;;  %v217_v32 = vld [vmem:[%s5467_s0 + $0x658] sm:$0xff]  ;;  %v601_v36 = vadd.f32 %v345_v30, %v89_v25 }
  0x67   :  { %1977 = vmatmul.mubr.bf16.gmra.mrb[4].mxu1 %v2783_v60  ;;  %v2796_v29 = vcombine.high %v4032_v18, %v4037_v19  ;;  %v1072_v33 = vpack.c.bf16 %v852_v21, %v850_v20  ;;  %v980_v34 = vmax.f32 %v724_v22, 0.0  ;;  %v471_v37 = vld [vmem:[%s5468_s1 + $0x648] sm:$0xff]  ;;  %v473_v38 = vld [vmem:[%s5468_s1 + $0x658] sm:$0xff]  ;;  %v86_v39 = vld [vmem:[%s5467_s0 + $0x240] sm:$0xff]  ;;  %v2791_v40 = vcombine.low %v4022_v12, %v4027_v17 }
  0x68   :  { %1986 = vmatprep.mubr.bf16.mxu1 %v2792_v23  ;;  %2363 = vmatmul.mubr.bf16.gmra.mrb[4].mxu0 %v2787_v7  ;;  %v727_v41 = vadd.f32 %v471_v37, %v215_v31  ;;  %v729_v42 = vadd.f32 %v473_v38, %v217_v32  ;;  %v88_v43 = vld [vmem:[%s5467_s0 + $0x250] sm:$0xff]  ;;  %v342_v44 = vld [vmem:[%s5468_s1 + $0x240] sm:$0xff]  ;;  %v855_v47 = vmax.f32 %v599_v35, 0.0  ;;  %v857_v48 = vmax.f32 %v601_v36, 0.0  ;;  %v91_v2 = vld [vmem:[%s5467_s0 + $0x268] sm:$0xff] }
  0x69   :  { %2515 = vmatprep.subr.bf16.mxu0 %v1137_v27  ;;  %v344_v45 = vld [vmem:[%s5468_s1 + $0x250] sm:$0xff]  ;;  %2130 = vmatpush1.bf16.msra.mxu1 %v1072_v33  ;;  %v1136_v46 = vpack.c.bf16 %v980_v34, %v978_v28  ;;  %v598_v49 = vadd.f32 %v342_v44, %v86_v39  ;;  %v214_v50 = vld [vmem:[%s5467_s0 + $0x640] sm:$0xff]  ;;  %v2795_v3 = vcombine.low %v4032_v18, %v4037_v19  ;;  %v93_v7 = vld [vmem:[%s5467_s0 + $0x278] sm:$0xff] }
  0x6a   :  { %2372 = vmatprep.mubr.bf16.mxu0 %v2796_v29  ;;  %v216_v51 = vld [vmem:[%s5467_s0 + $0x650] sm:$0xff]  ;;  %v470_v52 = vld [vmem:[%s5468_s1 + $0x640] sm:$0xff]  ;;  %v983_v53 = vmax.f32 %v727_v41, 0.0  ;;  %v985_v54 = vmax.f32 %v729_v42, 0.0  ;;  %v600_v55 = vadd.f32 %v344_v45, %v88_v43  ;;  %v1075_v60 = vpack.c.bf16 %v857_v48, %v855_v47  ;;  %v347_v8 = vld [vmem:[%s5468_s1 + $0x268] sm:$0xff] }
  0x6b   :  { %v472_v56 = vld [vmem:[%s5468_s1 + $0x650] sm:$0xff]  ;;  %v726_v57 = vadd.f32 %v470_v52, %v214_v50  ;;  %v4096_v58 = vld [vmem:[%s5469_s2 + $0xc0] sm:$0xff]  ;;  %2516 = vmatpush1.bf16.msra.mxu0 %v1136_v46  ;;  %v854_v61 = vmax.f32 %v598_v49, 0.0  ;;  %v349_v9 = vld [vmem:[%s5468_s1 + $0x278] sm:$0xff]  ;;  %v603_v12 = vadd.f32 %v347_v8, %v91_v2 }
  0x6c   :  { %v4101_v59 = vld [vmem:[%s5469_s2 + $0xe0] sm:$0xff]  ;;  %v728_v62 = vadd.f32 %v472_v56, %v216_v51  ;;  %v4108_v0 = vld [vmem:[%s5469_s2 + $0xd0] sm:$0xff]  ;;  %v1139_v4 = vpack.c.bf16 %v985_v54, %v983_v53  ;;  %v856_v5 = vmax.f32 %v600_v55, 0.0  ;;  %2131 = vmatprep.subr.bf16.mxu1 %v1075_v60  ;;  %v605_v13 = vadd.f32 %v349_v9, %v93_v7  ;;  %v219_v14 = vld [vmem:[%s5467_s0 + $0x668] sm:$0xff] }
  0x6d   :  { %v2800_v63 = vcombine.high %v4096_v58, %v4101_v59  ;;  %v4113_v1 = vld [vmem:[%s5469_s2 + $0xf0] sm:$0xff]  ;;  %v982_v6 = vmax.f32 %v726_v57, 0.0  ;;  %v221_v15 = vld [vmem:[%s5467_s0 + $0x678] sm:$0xff]  ;;  %v475_v16 = vld [vmem:[%s5468_s1 + $0x668] sm:$0xff]  ;;  %v859_v23 = vmax.f32 %v603_v12, 0.0  ;;  %v2799_v42 = vcombine.low %v4096_v58, %v4101_v59 }
  0x6e   :  { %v984_v10 = vmax.f32 %v728_v62, 0.0  ;;  %v2804_v11 = vcombine.high %v4108_v0, %v4113_v1  ;;  %2517 = vmatprep.subr.bf16.mxu0 %v1139_v4  ;;  %v1074_v17 = vpack.c.bf16 %v856_v5, %v854_v61  ;;  %v477_v18 = vld [vmem:[%s5468_s1 + $0x678] sm:$0xff]  ;;  %v731_v19 = vadd.f32 %v475_v16, %v219_v14  ;;  %v90_v20 = vld [vmem:[%s5467_s0 + $0x260] sm:$0xff]  ;;  %v92_v21 = vld [vmem:[%s5467_s0 + $0x270] sm:$0xff] }
  0x6f   :  { %1987 = vmatmul.mubr.bf16.gmra.mrb[8].mxu1 %v2791_v40  ;;  %v861_v24 = vmax.f32 %v605_v13, 0.0  ;;  %v733_v25 = vadd.f32 %v477_v18, %v221_v15  ;;  %v346_v26 = vld [vmem:[%s5468_s1 + $0x260] sm:$0xff]  ;;  %v348_v27 = vld [vmem:[%s5468_s1 + $0x270] sm:$0xff]  ;;  %v95_v46 = vld [vmem:[%s5467_s0 + $0x288] sm:$0xff]  ;;  %v2803_v48 = vcombine.low %v4108_v0, %v4113_v1 }
  0x70   :  { %v1138_v22 = vpack.c.bf16 %v984_v10, %v982_v6  ;;  %1996 = vmatprep.mubr.bf16.mxu1 %v2800_v63  ;;  %v218_v28 = vld [vmem:[%s5467_s0 + $0x660] sm:$0xff]  ;;  %2373 = vmatmul.mubr.bf16.gmra.mrb[8].mxu0 %v2795_v3  ;;  %v987_v29 = vmax.f32 %v731_v19, 0.0  ;;  %v602_v30 = vadd.f32 %v346_v26, %v90_v20  ;;  %v604_v31 = vadd.f32 %v348_v27, %v92_v21  ;;  %v220_v32 = vld [vmem:[%s5467_s0 + $0x670] sm:$0xff]  ;;  %v97_v47 = vld [vmem:[%s5467_s0 + $0x298] sm:$0xff] }
  0x71   :  { %2132 = vmatpush1.bf16.msra.mxu1 %v1074_v17  ;;  %v474_v33 = vld [vmem:[%s5468_s1 + $0x660] sm:$0xff]  ;;  %v476_v34 = vld [vmem:[%s5468_s1 + $0x670] sm:$0xff]  ;;  %2382 = vmatprep.mubr.bf16.mxu0 %v2804_v11  ;;  %v1077_v35 = vpack.c.bf16 %v861_v24, %v859_v23  ;;  %v989_v36 = vmax.f32 %v733_v25, 0.0  ;;  %v351_v52 = vld [vmem:[%s5468_s1 + $0x288] sm:$0xff] }
  0x72   :  { %2518 = vmatpush1.bf16.msra.mxu0 %v1138_v22  ;;  %v730_v37 = vadd.f32 %v474_v33, %v218_v28  ;;  %v732_v38 = vadd.f32 %v476_v34, %v220_v32  ;;  %v4170_v39 = vld [vmem:[%s5469_s2 + $0x100] sm:$0xff]  ;;  %v4180_v41 = vld [vmem:[%s5469_s2 + $0x110] sm:$0xff]  ;;  %v858_v43 = vmax.f32 %v602_v30, 0.0  ;;  %v860_v44 = vmax.f32 %v604_v31, 0.0  ;;  %v353_v53 = vld [vmem:[%s5468_s1 + $0x298] sm:$0xff] }
  0x73   :  { %v4175_v40 = vld [vmem:[%s5469_s2 + $0x120] sm:$0xff]  ;;  %v4187_v45 = vld [vmem:[%s5469_s2 + $0x130] sm:$0xff]  ;;  %2133 = vmatprep.subr.bf16.mxu1 %v1077_v35  ;;  %v1141_v49 = vpack.c.bf16 %v989_v36, %v987_v29  ;;  %v223_v54 = vld [vmem:[%s5467_s0 + $0x688] sm:$0xff]  ;;  %v607_v57 = vadd.f32 %v351_v52, %v95_v46  ;;  %v609_v58 = vadd.f32 %v353_v53, %v97_v47 }
  0x74   :  { %v986_v50 = vmax.f32 %v730_v37, 0.0  ;;  %v988_v51 = vmax.f32 %v732_v38, 0.0  ;;  %v1076_v55 = vpack.c.bf16 %v860_v44, %v858_v43  ;;  %v2808_v56 = vcombine.high %v4170_v39, %v4175_v40  ;;  %v225_v59 = vld [vmem:[%s5467_s0 + $0x698] sm:$0xff]  ;;  %v479_v60 = vld [vmem:[%s5468_s1 + $0x688] sm:$0xff]  ;;  %v94_v2 = vld [vmem:[%s5467_s0 + $0x280] sm:$0xff] }
  0x75   :  { %v481_v61 = vld [vmem:[%s5468_s1 + $0x698] sm:$0xff]  ;;  %2519 = vmatprep.subr.bf16.mxu0 %v1141_v49  ;;  %v2812_v63 = vcombine.high %v4180_v41, %v4187_v45  ;;  %v735_v0 = vadd.f32 %v479_v60, %v223_v54  ;;  %v96_v3 = vld [vmem:[%s5467_s0 + $0x290] sm:$0xff]  ;;  %v350_v4 = vld [vmem:[%s5468_s1 + $0x280] sm:$0xff]  ;;  %v863_v5 = vmax.f32 %v607_v57, 0.0  ;;  %v865_v6 = vmax.f32 %v609_v58, 0.0 }
  0x76   :  { %v1140_v62 = vpack.c.bf16 %v988_v51, %v986_v50  ;;  %v737_v1 = vadd.f32 %v481_v61, %v225_v59  ;;  %v352_v7 = vld [vmem:[%s5468_s1 + $0x290] sm:$0xff]  ;;  %v606_v8 = vadd.f32 %v350_v4, %v94_v2  ;;  %v222_v9 = vld [vmem:[%s5467_s0 + $0x680] sm:$0xff]  ;;  %2134 = vmatpush1.bf16.msra.mxu1 %v1076_v55  ;;  %v99_v26 = vld [vmem:[%s5467_s0 + $0x2a8] sm:$0xff]  ;;  %v2807_v29 = vcombine.low %v4170_v39, %v4175_v40 }
  0x77   :  { %1997 = vmatmul.mubr.bf16.gmra.mrb[12].mxu1 %v2799_v42  ;;  %v224_v10 = vld [vmem:[%s5467_s0 + $0x690] sm:$0xff]  ;;  %v991_v11 = vmax.f32 %v735_v0, 0.0  ;;  %v608_v13 = vadd.f32 %v352_v7, %v96_v3  ;;  %v478_v14 = vld [vmem:[%s5468_s1 + $0x680] sm:$0xff]  ;;  %v1079_v17 = vpack.c.bf16 %v865_v6, %v863_v5  ;;  %v101_v27 = vld [vmem:[%s5467_s0 + $0x2b8] sm:$0xff]  ;;  %v2811_v36 = vcombine.low %v4180_v41, %v4187_v45 }
  0x78   :  { %2520 = vmatpush1.bf16.msra.mxu0 %v1140_v62  ;;  %v993_v12 = vmax.f32 %v737_v1, 0.0  ;;  %v480_v15 = vld [vmem:[%s5468_s1 + $0x690] sm:$0xff]  ;;  %v4246_v16 = vld [vmem:[%s5469_s2 + $0x140] sm:$0xff]  ;;  %2006 = vmatprep.mubr.bf16.mxu1 %v2808_v56  ;;  %v862_v18 = vmax.f32 %v606_v8, 0.0  ;;  %v734_v19 = vadd.f32 %v478_v14, %v222_v9  ;;  %v355_v28 = vld [vmem:[%s5468_s1 + $0x2a8] sm:$0xff] }
  0x79   :  { %2383 = vmatmul.mubr.bf16.gmra.mrb[12].mxu0 %v2803_v48  ;;  %v736_v20 = vadd.f32 %v480_v15, %v224_v10  ;;  %v4251_v21 = vld [vmem:[%s5469_s2 + $0x160] sm:$0xff]  ;;  %v4256_v22 = vld [vmem:[%s5469_s2 + $0x150] sm:$0xff]  ;;  %v864_v25 = vmax.f32 %v608_v13, 0.0  ;;  %2135 = vmatprep.subr.bf16.mxu1 %v1079_v17  ;;  %v357_v32 = vld [vmem:[%s5468_s1 + $0x2b8] sm:$0xff]  ;;  %v611_v33 = vadd.f32 %v355_v28, %v99_v26 }
  0x7a   :  { %v4261_v23 = vld [vmem:[%s5469_s2 + $0x170] sm:$0xff]  ;;  %2392 = vmatprep.mubr.bf16.mxu0 %v2812_v63  ;;  %v1143_v24 = vpack.c.bf16 %v993_v12, %v991_v11  ;;  %v990_v30 = vmax.f32 %v734_v19, 0.0  ;;  %v227_v34 = vld [vmem:[%s5467_s0 + $0x6a8] sm:$0xff]  ;;  %v229_v35 = vld [vmem:[%s5467_s0 + $0x6b8] sm:$0xff]  ;;  %v2816_v38 = vcombine.high %v4246_v16, %v4251_v21  ;;  %v613_v39 = vadd.f32 %v357_v32, %v101_v27 }
  0x7b   :  { %v992_v31 = vmax.f32 %v736_v20, 0.0  ;;  %v1078_v37 = vpack.c.bf16 %v864_v25, %v862_v18  ;;  %v483_v40 = vld [vmem:[%s5468_s1 + $0x6a8] sm:$0xff]  ;;  %v485_v42 = vld [vmem:[%s5468_s1 + $0x6b8] sm:$0xff]  ;;  %v98_v43 = vld [vmem:[%s5467_s0 + $0x2a0] sm:$0xff]  ;;  %v867_v41 = vmax.f32 %v611_v33, 0.0  ;;  %v2820_v50 = vcombine.high %v4256_v22, %v4261_v23 }
  0x7c   :  { %2521 = vmatprep.subr.bf16.mxu0 %v1143_v24  ;;  %v739_v45 = vadd.f32 %v483_v40, %v227_v34  ;;  %v741_v46 = vadd.f32 %v485_v42, %v229_v35  ;;  %v100_v47 = vld [vmem:[%s5467_s0 + $0x2b0] sm:$0xff]  ;;  %v354_v48 = vld [vmem:[%s5468_s1 + $0x2a0] sm:$0xff]  ;;  %v869_v51 = vmax.f32 %v613_v39, 0.0  ;;  %v103_v3 = vld [vmem:[%s5467_s0 + $0x2c8] sm:$0xff]  ;;  %v2815_v18 = vcombine.low %v4246_v16, %v4251_v21 }
  0x7d   :  { %v1142_v44 = vpack.c.bf16 %v992_v31, %v990_v30  ;;  %v356_v49 = vld [vmem:[%s5468_s1 + $0x2b0] sm:$0xff]  ;;  %2136 = vmatpush1.bf16.msra.mxu1 %v1078_v37  ;;  %v610_v52 = vadd.f32 %v354_v48, %v98_v43  ;;  %v226_v54 = vld [vmem:[%s5467_s0 + $0x6a0] sm:$0xff]  ;;  %v105_v8 = vld [vmem:[%s5467_s0 + $0x2d8] sm:$0xff]  ;;  %v2819_v19 = vcombine.low %v4256_v22, %v4261_v23 }
  0x7e   :  { %v612_v53 = vadd.f32 %v356_v49, %v100_v47  ;;  %v228_v55 = vld [vmem:[%s5467_s0 + $0x6b0] sm:$0xff]  ;;  %v482_v56 = vld [vmem:[%s5468_s1 + $0x6a0] sm:$0xff]  ;;  %v995_v57 = vmax.f32 %v739_v45, 0.0  ;;  %v997_v58 = vmax.f32 %v741_v46, 0.0  ;;  %v1081_v61 = vpack.c.bf16 %v869_v51, %v867_v41  ;;  %v359_v9 = vld [vmem:[%s5468_s1 + $0x2c8] sm:$0xff] }
  0x7f   :  { %2007 = vmatmul.mubr.bf16.gmra.mrb[16].mxu1 %v2807_v29  ;;  %2522 = vmatpush1.bf16.msra.mxu0 %v1142_v44  ;;  %v484_v59 = vld [vmem:[%s5468_s1 + $0x6b0] sm:$0xff]  ;;  %v738_v60 = vadd.f32 %v482_v56, %v226_v54  ;;  %v866_v62 = vmax.f32 %v610_v52, 0.0  ;;  %v4322_v1 = vld [vmem:[%s5469_s2 + $0x180] sm:$0xff]  ;;  %v361_v10 = vld [vmem:[%s5468_s1 + $0x2d8] sm:$0xff]  ;;  %v615_v13 = vadd.f32 %v359_v9, %v103_v3 }
  0x80   :  { %2016 = vmatprep.mubr.bf16.mxu1 %v2816_v38  ;;  %v868_v63 = vmax.f32 %v612_v53, 0.0  ;;  %v740_v0 = vadd.f32 %v484_v59, %v228_v55  ;;  %v4327_v2 = vld [vmem:[%s5469_s2 + $0x1a0] sm:$0xff]  ;;  %v1145_v4 = vpack.c.bf16 %v997_v58, %v995_v57  ;;  %v4335_v6 = vld [vmem:[%s5469_s2 + $0x190] sm:$0xff]  ;;  %2137 = vmatprep.subr.bf16.mxu1 %v1081_v61  ;;  %v231_v14 = vld [vmem:[%s5467_s0 + $0x6c8] sm:$0xff]  ;;  %v617_v20 = vadd.f32 %v361_v10, %v105_v8 }
  0x81   :  { %2393 = vmatmul.mubr.bf16.gmra.mrb[16].mxu0 %v2811_v36  ;;  %v994_v5 = vmax.f32 %v738_v60, 0.0  ;;  %v4340_v7 = vld [vmem:[%s5469_s2 + $0x1b0] sm:$0xff]  ;;  %v233_v15 = vld [vmem:[%s5467_s0 + $0x6d8] sm:$0xff]  ;;  %v487_v17 = vld [vmem:[%s5468_s1 + $0x6c8] sm:$0xff]  ;;  %v2824_v21 = vcombine.high %v4322_v1, %v4327_v2  ;;  %v871_v22 = vmax.f32 %v615_v13, 0.0 }
  0x82   :  { %2402 = vmatprep.mubr.bf16.mxu0 %v2820_v50  ;;  %v1080_v11 = vpack.c.bf16 %v868_v63, %v866_v62  ;;  %v996_v12 = vmax.f32 %v740_v0, 0.0  ;;  %2523 = vmatprep.subr.bf16.mxu0 %v1145_v4  ;;  %v489_v24 = vld [vmem:[%s5468_s1 + $0x6d8] sm:$0xff]  ;;  %v743_v25 = vadd.f32 %v487_v17, %v231_v14  ;;  %v102_v26 = vld [vmem:[%s5467_s0 + $0x2c0] sm:$0xff]  ;;  %v104_v27 = vld [vmem:[%s5467_s0 + $0x2d0] sm:$0xff]  ;;  %v873_v31 = vmax.f32 %v617_v20, 0.0 }
  0x83   :  { %v745_v23 = vadd.f32 %v489_v24, %v233_v15  ;;  %v358_v28 = vld [vmem:[%s5468_s1 + $0x2c0] sm:$0xff]  ;;  %v360_v29 = vld [vmem:[%s5468_s1 + $0x2d0] sm:$0xff]  ;;  %v2828_v38 = vcombine.high %v4335_v6, %v4340_v7  ;;  %v107_v47 = vld [vmem:[%s5467_s0 + $0x2e8] sm:$0xff]  ;;  %v2823_v62 = vcombine.low %v4322_v1, %v4327_v2  ;;  %v2827_v13 = vcombine.low %v4335_v6, %v4340_v7 }
  0x84   :  { %2138 = vmatpush1.bf16.msra.mxu1 %v1080_v11  ;;  %v1144_v16 = vpack.c.bf16 %v996_v12, %v994_v5  ;;  %v230_v30 = vld [vmem:[%s5467_s0 + $0x6c0] sm:$0xff]  ;;  %v999_v32 = vmax.f32 %v743_v25, 0.0  ;;  %v614_v33 = vadd.f32 %v358_v28, %v102_v26  ;;  %v616_v34 = vadd.f32 %v360_v29, %v104_v27  ;;  %v232_v35 = vld [vmem:[%s5467_s0 + $0x6d0] sm:$0xff]  ;;  %v109_v48 = vld [vmem:[%s5467_s0 + $0x2f8] sm:$0xff] }
  0x85   :  { %v486_v36 = vld [vmem:[%s5468_s1 + $0x6c0] sm:$0xff]  ;;  %v488_v37 = vld [vmem:[%s5468_s1 + $0x6d0] sm:$0xff]  ;;  %v1001_v39 = vmax.f32 %v745_v23, 0.0  ;;  %v1083_v43 = vpack.c.bf16 %v873_v31, %v871_v22  ;;  %v363_v52 = vld [vmem:[%s5468_s1 + $0x2e8] sm:$0xff] }
  0x86   :  { %2524 = vmatpush1.bf16.msra.mxu0 %v1144_v16  ;;  %v742_v40 = vadd.f32 %v486_v36, %v230_v30  ;;  %v744_v42 = vadd.f32 %v488_v37, %v232_v35  ;;  %v870_v44 = vmax.f32 %v614_v33, 0.0  ;;  %v872_v41 = vmax.f32 %v616_v34, 0.0  ;;  %v4398_v45 = vld [vmem:[%s5469_s2 + $0x1c0] sm:$0xff]  ;;  %v365_v53 = vld [vmem:[%s5468_s1 + $0x2f8] sm:$0xff]  ;;  %v235_v54 = vld [vmem:[%s5467_s0 + $0x6e8] sm:$0xff] }
  0x87   :  { %2017 = vmatmul.mubr.bf16.gmra.mrb[20].mxu1 %v2815_v18  ;;  %v4403_v46 = vld [vmem:[%s5469_s2 + $0x1e0] sm:$0xff]  ;;  %v1147_v49 = vpack.c.bf16 %v1001_v39, %v999_v32  ;;  %2139 = vmatprep.subr.bf16.mxu1 %v1083_v43  ;;  %v4423_v56 = vld [vmem:[%s5469_s2 + $0x1d0] sm:$0xff]  ;;  %v619_v58 = vadd.f32 %v363_v52, %v107_v47  ;;  %v237_v59 = vld [vmem:[%s5467_s0 + $0x6f8] sm:$0xff]  ;;  %v621_v0 = vadd.f32 %v365_v53, %v109_v48 }
  0x88   :  { %2026 = vmatprep.mubr.bf16.mxu1 %v2824_v21  ;;  %v998_v50 = vmax.f32 %v742_v40, 0.0  ;;  %v1000_v51 = vmax.f32 %v744_v42, 0.0  ;;  %v1082_v55 = vpack.c.bf16 %v872_v41, %v870_v44  ;;  %v4428_v57 = vld [vmem:[%s5469_s2 + $0x1f0] sm:$0xff]  ;;  %v491_v60 = vld [vmem:[%s5468_s1 + $0x6e8] sm:$0xff]  ;;  %v493_v61 = vld [vmem:[%s5468_s1 + $0x6f8] sm:$0xff]  ;;  %v2832_v14 = vcombine.high %v4398_v45, %v4403_v46 }
  0x89   :  { %2403 = vmatmul.mubr.bf16.gmra.mrb[20].mxu0 %v2819_v19  ;;  %2525 = vmatprep.subr.bf16.mxu0 %v1147_v49  ;;  %v106_v3 = vld [vmem:[%s5467_s0 + $0x2e0] sm:$0xff]  ;;  %v108_v4 = vld [vmem:[%s5467_s0 + $0x2f0] sm:$0xff]  ;;  %v875_v8 = vmax.f32 %v619_v58, 0.0  ;;  %v747_v9 = vadd.f32 %v491_v60, %v235_v54  ;;  %v749_v10 = vadd.f32 %v493_v61, %v237_v59  ;;  %v877_v15 = vmax.f32 %v621_v0, 0.0  ;;  %v111_v21 = vld [vmem:[%s5467_s0 + $0x308] sm:$0xff] }
  0x8a   :  { %2412 = vmatprep.mubr.bf16.mxu0 %v2828_v38  ;;  %v1146_v63 = vpack.c.bf16 %v1000_v51, %v998_v50  ;;  %v362_v5 = vld [vmem:[%s5468_s1 + $0x2e0] sm:$0xff]  ;;  %2140 = vmatpush1.bf16.msra.mxu1 %v1082_v55  ;;  %v364_v1 = vld [vmem:[%s5468_s1 + $0x2f0] sm:$0xff]  ;;  %v2836_v6 = vcombine.high %v4423_v56, %v4428_v57  ;;  %v113_v22 = vld [vmem:[%s5467_s0 + $0x318] sm:$0xff]  ;;  %v2831_v43 = vcombine.low %v4398_v45, %v4403_v46 }
  0x8b   :  { %v618_v2 = vadd.f32 %v362_v5, %v106_v3  ;;  %v234_v11 = vld [vmem:[%s5467_s0 + $0x6e0] sm:$0xff]  ;;  %v236_v12 = vld [vmem:[%s5467_s0 + $0x6f0] sm:$0xff]  ;;  %v620_v17 = vadd.f32 %v364_v1, %v108_v4  ;;  %v1003_v20 = vmax.f32 %v747_v9, 0.0  ;;  %v1005_v24 = vmax.f32 %v749_v10, 0.0  ;;  %v367_v23 = vld [vmem:[%s5468_s1 + $0x308] sm:$0xff] }
  0x8c   :  { %2526 = vmatpush1.bf16.msra.mxu0 %v1146_v63  ;;  %v490_v18 = vld [vmem:[%s5468_s1 + $0x6e0] sm:$0xff]  ;;  %v492_v19 = vld [vmem:[%s5468_s1 + $0x6f0] sm:$0xff]  ;;  %v1085_v7 = vpack.c.bf16 %v877_v15, %v875_v8  ;;  %v369_v32 = vld [vmem:[%s5468_s1 + $0x318] sm:$0xff]  ;;  %v623_v37 = vadd.f32 %v367_v23, %v111_v21  ;;  %v2835_v9 = vcombine.low %v4423_v56, %v4428_v57 }
  0x8d   :  { %v874_v25 = vmax.f32 %v618_v2, 0.0  ;;  %v746_v26 = vadd.f32 %v490_v18, %v234_v11  ;;  %v876_v27 = vmax.f32 %v620_v17, 0.0  ;;  %v748_v16 = vadd.f32 %v492_v19, %v236_v12  ;;  %v4483_v30 = vld [vmem:[%s5469_s2 + $0x200] sm:$0xff]  ;;  %v239_v33 = vld [vmem:[%s5467_s0 + $0x708] sm:$0xff]  ;;  %v241_v34 = vld [vmem:[%s5467_s0 + $0x718] sm:$0xff] }
  0x8e   :  { %v1149_v28 = vpack.c.bf16 %v1005_v24, %v1003_v20  ;;  %v4488_v31 = vld [vmem:[%s5469_s2 + $0x220] sm:$0xff]  ;;  %2141 = vmatprep.subr.bf16.mxu1 %v1085_v7  ;;  %v625_v38 = vadd.f32 %v369_v32, %v113_v22  ;;  %v495_v39 = vld [vmem:[%s5468_s1 + $0x708] sm:$0xff]  ;;  %v497_v40 = vld [vmem:[%s5468_s1 + $0x718] sm:$0xff]  ;;  %v879_v51 = vmax.f32 %v623_v37, 0.0 }
  0x8f   :  { %2027 = vmatmul.mubr.bf16.gmra.mrb[24].mxu1 %v2823_v62  ;;  %v1002_v29 = vmax.f32 %v746_v26, 0.0  ;;  %v1084_v35 = vpack.c.bf16 %v876_v27, %v874_v25  ;;  %v1004_v36 = vmax.f32 %v748_v16, 0.0  ;;  %v110_v42 = vld [vmem:[%s5467_s0 + $0x300] sm:$0xff]  ;;  %v751_v44 = vadd.f32 %v495_v39, %v239_v33  ;;  %v112_v47 = vld [vmem:[%s5467_s0 + $0x310] sm:$0xff]  ;;  %v115_v8 = vld [vmem:[%s5467_s0 + $0x328] sm:$0xff] }
  0x90   :  { %2036 = vmatprep.mubr.bf16.mxu1 %v2832_v14  ;;  %2527 = vmatprep.subr.bf16.mxu0 %v1149_v28  ;;  %v753_v41 = vadd.f32 %v497_v40, %v241_v34  ;;  %v366_v48 = vld [vmem:[%s5468_s1 + $0x300] sm:$0xff]  ;;  %v368_v49 = vld [vmem:[%s5468_s1 + $0x310] sm:$0xff]  ;;  %v881_v45 = vmax.f32 %v625_v38, 0.0  ;;  %v2840_v0 = vcombine.high %v4483_v30, %v4488_v31  ;;  %v117_v11 = vld [vmem:[%s5467_s0 + $0x338] sm:$0xff] }
  0x91   :  { %2413 = vmatmul.mubr.bf16.gmra.mrb[24].mxu0 %v2827_v13  ;;  %2142 = vmatpush1.bf16.msra.mxu1 %v1084_v35  ;;  %v1148_v50 = vpack.c.bf16 %v1004_v36, %v1002_v29  ;;  %v622_v46 = vadd.f32 %v366_v48, %v110_v42  ;;  %v238_v52 = vld [vmem:[%s5467_s0 + $0x700] sm:$0xff]  ;;  %v240_v53 = vld [vmem:[%s5467_s0 + $0x710] sm:$0xff]  ;;  %v1007_v59 = vmax.f32 %v751_v44, 0.0  ;;  %v624_v61 = vadd.f32 %v368_v49, %v112_v47  ;;  %v371_v12 = vld [vmem:[%s5468_s1 + $0x328] sm:$0xff] }
  0x92   :  { %2422 = vmatprep.mubr.bf16.mxu0 %v2836_v6  ;;  %v494_v54 = vld [vmem:[%s5468_s1 + $0x700] sm:$0xff]  ;;  %v4531_v55 = vld [vmem:[%s5469_s2 + $0x210] sm:$0xff]  ;;  %v1009_v60 = vmax.f32 %v753_v41, 0.0  ;;  %v1087_v3 = vpack.c.bf16 %v881_v45, %v879_v51  ;;  %v373_v13 = vld [vmem:[%s5468_s1 + $0x338] sm:$0xff]  ;;  %v627_v57 = vadd.f32 %v371_v12, %v115_v8  ;;  %v2839_v41 = vcombine.low %v4483_v30, %v4488_v31 }
  0x93   :  { %v4536_v58 = vld [vmem:[%s5469_s2 + $0x230] sm:$0xff]  ;;  %v750_v63 = vadd.f32 %v494_v54, %v238_v52  ;;  %2528 = vmatpush1.bf16.msra.mxu0 %v1148_v50  ;;  %v878_v4 = vmax.f32 %v622_v46, 0.0  ;;  %v880_v1 = vmax.f32 %v624_v61, 0.0  ;;  %v629_v15 = vadd.f32 %v373_v13, %v117_v11  ;;  %v243_v17 = vld [vmem:[%s5467_s0 + $0x728] sm:$0xff]  ;;  %v245_v18 = vld [vmem:[%s5467_s0 + $0x738] sm:$0xff] }
  0x94   :  { %v496_v62 = vld [vmem:[%s5468_s1 + $0x710] sm:$0xff]  ;;  %v1151_v10 = vpack.c.bf16 %v1009_v60, %v1007_v59  ;;  %v2844_v14 = vcombine.high %v4531_v55, %v4536_v58  ;;  %2143 = vmatprep.subr.bf16.mxu1 %v1087_v3  ;;  %v499_v19 = vld [vmem:[%s5468_s1 + $0x728] sm:$0xff]  ;;  %v4571_v24 = vld [vmem:[%s5469_s2 + $0x240] sm:$0xff]  ;;  %v883_v21 = vmax.f32 %v627_v57, 0.0  ;;  %v2843_v59 = vcombine.low %v4531_v55, %v4536_v58 }
  0x95   :  { %v752_v5 = vadd.f32 %v496_v62, %v240_v53  ;;  %v1006_v2 = vmax.f32 %v750_v63, 0.0  ;;  %v1086_v20 = vpack.c.bf16 %v880_v1, %v878_v4  ;;  %v4576_v25 = vld [vmem:[%s5469_s2 + $0x260] sm:$0xff]  ;;  %v501_v26 = vld [vmem:[%s5468_s1 + $0x738] sm:$0xff]  ;;  %v755_v6 = vadd.f32 %v499_v19, %v243_v17  ;;  %v116_v27 = vld [vmem:[%s5467_s0 + $0x330] sm:$0xff] }
  0x96   :  { %2529 = vmatprep.subr.bf16.mxu0 %v1151_v10  ;;  %v114_v7 = vld [vmem:[%s5467_s0 + $0x320] sm:$0xff]  ;;  %v885_v22 = vmax.f32 %v629_v15, 0.0  ;;  %v757_v23 = vadd.f32 %v501_v26, %v245_v18  ;;  %v372_v29 = vld [vmem:[%s5468_s1 + $0x330] sm:$0xff]  ;;  %v119_v50 = vld [vmem:[%s5467_s0 + $0x348] sm:$0xff]  ;;  %v2848_v45 = vcombine.high %v4571_v24, %v4576_v25 }
  0x97   :  { %v1008_v56 = vmax.f32 %v752_v5, 0.0  ;;  %2037 = vmatmul.mubr.bf16.gmra.mrb[28].mxu1 %v2831_v43  ;;  %v370_v28 = vld [vmem:[%s5468_s1 + $0x320] sm:$0xff]  ;;  %v1011_v33 = vmax.f32 %v755_v6, 0.0  ;;  %v628_v35 = vadd.f32 %v372_v29, %v116_v27  ;;  %v244_v36 = vld [vmem:[%s5467_s0 + $0x730] sm:$0xff]  ;;  %v121_v51 = vld [vmem:[%s5467_s0 + $0x358] sm:$0xff] }
  0x98   :  { %2046 = vmatprep.mubr.bf16.mxu1 %v2840_v0  ;;  %v242_v32 = vld [vmem:[%s5467_s0 + $0x720] sm:$0xff]  ;;  %2144 = vmatpush1.bf16.msra.mxu1 %v1086_v20  ;;  %v626_v34 = vadd.f32 %v370_v28, %v114_v7  ;;  %v500_v38 = vld [vmem:[%s5468_s1 + $0x730] sm:$0xff]  ;;  %v1089_v40 = vpack.c.bf16 %v885_v22, %v883_v21  ;;  %v1013_v42 = vmax.f32 %v757_v23, 0.0  ;;  %v375_v52 = vld [vmem:[%s5468_s1 + $0x348] sm:$0xff] }
  0x99   :  { %v1150_v16 = vpack.c.bf16 %v1008_v56, %v1006_v2  ;;  %2423 = vmatmul.mubr.bf16.gmra.mrb[28].mxu0 %v2835_v9  ;;  %v498_v37 = vld [vmem:[%s5468_s1 + $0x720] sm:$0xff]  ;;  %v4608_v39 = vld [vmem:[%s5469_s2 + $0x250] sm:$0xff]  ;;  %v756_v44 = vadd.f32 %v500_v38, %v244_v36  ;;  %v884_v49 = vmax.f32 %v628_v35, 0.0  ;;  %v377_v53 = vld [vmem:[%s5468_s1 + $0x358] sm:$0xff]  ;;  %v631_v61 = vadd.f32 %v375_v52, %v119_v50 }
  0x9a   :  { %2432 = vmatprep.mubr.bf16.mxu0 %v2844_v14  ;;  %v754_v43 = vadd.f32 %v498_v37, %v242_v32  ;;  %v4615_v47 = vld [vmem:[%s5469_s2 + $0x270] sm:$0xff]  ;;  %v882_v48 = vmax.f32 %v626_v34, 0.0  ;;  %2145 = vmatprep.subr.bf16.mxu1 %v1089_v40  ;;  %v1153_v30 = vpack.c.bf16 %v1013_v42, %v1011_v33  ;;  %v247_v54 = vld [vmem:[%s5467_s0 + $0x748] sm:$0xff]  ;;  %v633_v62 = vadd.f32 %v377_v53, %v121_v51  ;;  %v249_v63 = vld [vmem:[%s5467_s0 + $0x758] sm:$0xff] }
  0x9b   :  { %2530 = vmatpush1.bf16.msra.mxu0 %v1150_v16  ;;  %v1012_v46 = vmax.f32 %v756_v44, 0.0  ;;  %v503_v0 = vld [vmem:[%s5468_s1 + $0x748] sm:$0xff]  ;;  %v505_v3 = vld [vmem:[%s5468_s1 + $0x758] sm:$0xff]  ;;  %v2852_v4 = vcombine.high %v4608_v39, %v4615_v47  ;;  %v118_v8 = vld [vmem:[%s5467_s0 + $0x340] sm:$0xff]  ;;  %v887_v1 = vmax.f32 %v631_v61, 0.0  ;;  %v2847_v33 = vcombine.low %v4571_v24, %v4576_v25 }
  0x9c   :  { %v1010_v31 = vmax.f32 %v754_v43, 0.0  ;;  %v1088_v60 = vpack.c.bf16 %v884_v49, %v882_v48  ;;  %2531 = vmatprep.subr.bf16.mxu0 %v1153_v30  ;;  %v759_v58 = vadd.f32 %v503_v0, %v247_v54  ;;  %v761_v5 = vadd.f32 %v505_v3, %v249_v63  ;;  %v120_v9 = vld [vmem:[%s5467_s0 + $0x350] sm:$0xff]  ;;  %v374_v10 = vld [vmem:[%s5468_s1 + $0x340] sm:$0xff]  ;;  %v123_v28 = vld [vmem:[%s5467_s0 + $0x368] sm:$0xff] }
  0x9d   :  { %v889_v2 = vmax.f32 %v633_v62, 0.0  ;;  %v376_v11 = vld [vmem:[%s5468_s1 + $0x350] sm:$0xff]  ;;  %v630_v12 = vadd.f32 %v374_v10, %v118_v8  ;;  %v246_v13 = vld [vmem:[%s5467_s0 + $0x740] sm:$0xff]  ;;  %v125_v29 = vld [vmem:[%s5467_s0 + $0x378] sm:$0xff]  ;;  %v2851_v42 = vcombine.low %v4608_v39, %v4615_v47 }
  0x9e   :  { %v1152_v55 = vpack.c.bf16 %v1012_v46, %v1010_v31  ;;  %v248_v14 = vld [vmem:[%s5467_s0 + $0x750] sm:$0xff]  ;;  %2146 = vmatpush1.bf16.msra.mxu1 %v1088_v60  ;;  %v4668_v56 = vld [vmem:[%s5469_s2 + $0x280] sm:$0xff]  ;;  %v1015_v57 = vmax.f32 %v759_v58, 0.0  ;;  %v1017_v15 = vmax.f32 %v761_v5, 0.0  ;;  %v632_v17 = vadd.f32 %v376_v11, %v120_v9  ;;  %v379_v32 = vld [vmem:[%s5468_s1 + $0x368] sm:$0xff] }
  0x9f   :  { %2047 = vmatmul.mubr.bf16.gmra.mrb[32].mxu1 %v2839_v41  ;;  %v502_v18 = vld [vmem:[%s5468_s1 + $0x740] sm:$0xff]  ;;  %v504_v19 = vld [vmem:[%s5468_s1 + $0x750] sm:$0xff]  ;;  %v1091_v7 = vpack.c.bf16 %v889_v2, %v887_v1  ;;  %v886_v27 = vmax.f32 %v630_v12, 0.0  ;;  %v381_v36 = vld [vmem:[%s5468_s1 + $0x378] sm:$0xff]  ;;  %v635_v37 = vadd.f32 %v379_v32, %v123_v28 }
  0xa0   :  { %2056 = vmatprep.mubr.bf16.mxu1 %v2848_v45  ;;  %v4679_v20 = vld [vmem:[%s5469_s2 + $0x2a0] sm:$0xff]  ;;  %v4684_v26 = vld [vmem:[%s5469_s2 + $0x290] sm:$0xff]  ;;  %v758_v16 = vadd.f32 %v502_v18, %v246_v13  ;;  %v760_v21 = vadd.f32 %v504_v19, %v248_v14  ;;  %2532 = vmatpush1.bf16.msra.mxu0 %v1152_v55  ;;  %v1155_v22 = vpack.c.bf16 %v1017_v15, %v1015_v57  ;;  %v888_v23 = vmax.f32 %v632_v17, 0.0  ;;  %v251_v38 = vld [vmem:[%s5467_s0 + $0x768] sm:$0xff] }
  0xa1   :  { %2433 = vmatmul.mubr.bf16.gmra.mrb[32].mxu0 %v2843_v59  ;;  %v4689_v6 = vld [vmem:[%s5469_s2 + $0x2b0] sm:$0xff]  ;;  %2147 = vmatprep.subr.bf16.mxu1 %v1091_v7  ;;  %v253_v40 = vld [vmem:[%s5467_s0 + $0x778] sm:$0xff]  ;;  %v2856_v24 = vcombine.high %v4668_v56, %v4679_v20  ;;  %v637_v43 = vadd.f32 %v381_v36, %v125_v29  ;;  %v507_v44 = vld [vmem:[%s5468_s1 + $0x768] sm:$0xff]  ;;  %v891_v39 = vmax.f32 %v635_v37, 0.0 }
  0xa2   :  { %2442 = vmatprep.mubr.bf16.mxu0 %v2852_v4  ;;  %v1014_v34 = vmax.f32 %v758_v16, 0.0  ;;  %v1016_v35 = vmax.f32 %v760_v21, 0.0  ;;  %2533 = vmatprep.subr.bf16.mxu0 %v1155_v22  ;;  %v1090_v25 = vpack.c.bf16 %v888_v23, %v886_v27  ;;  %v509_v41 = vld [vmem:[%s5468_s1 + $0x778] sm:$0xff]  ;;  %v122_v48 = vld [vmem:[%s5467_s0 + $0x360] sm:$0xff]  ;;  %v763_v47 = vadd.f32 %v507_v44, %v251_v38  ;;  %v124_v51 = vld [vmem:[%s5467_s0 + $0x370] sm:$0xff] }
  0xa3   :  { %v765_v50 = vadd.f32 %v509_v41, %v253_v40  ;;  %v378_v45 = vld [vmem:[%s5468_s1 + $0x360] sm:$0xff]  ;;  %v380_v30 = vld [vmem:[%s5468_s1 + $0x370] sm:$0xff]  ;;  %v2860_v31 = vcombine.high %v4684_v26, %v4689_v6  ;;  %v893_v46 = vmax.f32 %v637_v43, 0.0  ;;  %v127_v9 = vld [vmem:[%s5467_s0 + $0x388] sm:$0xff]  ;;  %v2855_v27 = vcombine.low %v4668_v56, %v4679_v20 }
  0xa4   :  { %v1154_v49 = vpack.c.bf16 %v1016_v35, %v1014_v34  ;;  %2148 = vmatpush1.bf16.msra.mxu1 %v1090_v25  ;;  %v634_v52 = vadd.f32 %v378_v45, %v122_v48  ;;  %v636_v53 = vadd.f32 %v380_v30, %v124_v51  ;;  %v250_v54 = vld [vmem:[%s5467_s0 + $0x760] sm:$0xff]  ;;  %v252_v59 = vld [vmem:[%s5467_s0 + $0x770] sm:$0xff]  ;;  %v1019_v61 = vmax.f32 %v763_v47, 0.0  ;;  %v129_v12 = vld [vmem:[%s5467_s0 + $0x398] sm:$0xff] }
  0xa5   :  { %v506_v60 = vld [vmem:[%s5468_s1 + $0x760] sm:$0xff]  ;;  %v1021_v62 = vmax.f32 %v765_v50, 0.0  ;;  %v508_v63 = vld [vmem:[%s5468_s1 + $0x770] sm:$0xff]  ;;  %v1093_v55 = vpack.c.bf16 %v893_v46, %v891_v39  ;;  %v383_v13 = vld [vmem:[%s5468_s1 + $0x388] sm:$0xff]  ;;  %v2859_v16 = vcombine.low %v4684_v26, %v4689_v6 }
  0xa6   :  { %2534 = vmatpush1.bf16.msra.mxu0 %v1154_v49  ;;  %v762_v0 = vadd.f32 %v506_v60, %v250_v54  ;;  %v4750_v3 = vld [vmem:[%s5469_s2 + $0x2c0] sm:$0xff]  ;;  %v890_v58 = vmax.f32 %v634_v52, 0.0  ;;  %v892_v5 = vmax.f32 %v636_v53, 0.0  ;;  %v764_v8 = vadd.f32 %v508_v63, %v252_v59  ;;  %v4763_v10 = vld [vmem:[%s5469_s2 + $0x2d0] sm:$0xff]  ;;  %v385_v14 = vld [vmem:[%s5468_s1 + $0x398] sm:$0xff] }
  0xa7   :  { %2057 = vmatmul.mubr.bf16.gmra.mrb[36].mxu1 %v2847_v33  ;;  %v4755_v4 = vld [vmem:[%s5469_s2 + $0x2e0] sm:$0xff]  ;;  %v4768_v1 = vld [vmem:[%s5469_s2 + $0x2f0] sm:$0xff]  ;;  %v1157_v2 = vpack.c.bf16 %v1021_v62, %v1019_v61  ;;  %2149 = vmatprep.subr.bf16.mxu1 %v1093_v55  ;;  %v639_v17 = vadd.f32 %v383_v13, %v127_v9  ;;  %v255_v18 = vld [vmem:[%s5467_s0 + $0x788] sm:$0xff]  ;;  %v641_v21 = vadd.f32 %v385_v14, %v129_v12 }
  0xa8   :  { %2066 = vmatprep.mubr.bf16.mxu1 %v2856_v24  ;;  %v1018_v11 = vmax.f32 %v762_v0, 0.0  ;;  %v1092_v57 = vpack.c.bf16 %v892_v5, %v890_v58  ;;  %v1020_v15 = vmax.f32 %v764_v8, 0.0  ;;  %v257_v19 = vld [vmem:[%s5467_s0 + $0x798] sm:$0xff]  ;;  %v511_v7 = vld [vmem:[%s5468_s1 + $0x788] sm:$0xff]  ;;  %v126_v28 = vld [vmem:[%s5467_s0 + $0x380] sm:$0xff]  ;;  %v2864_v56 = vcombine.high %v4750_v3, %v4755_v4 }
  0xa9   :  { %2443 = vmatmul.mubr.bf16.gmra.mrb[36].mxu0 %v2851_v42  ;;  %2535 = vmatprep.subr.bf16.mxu0 %v1157_v2  ;;  %v513_v22 = vld [vmem:[%s5468_s1 + $0x798] sm:$0xff]  ;;  %v767_v23 = vadd.f32 %v511_v7, %v255_v18  ;;  %v128_v29 = vld [vmem:[%s5467_s0 + $0x390] sm:$0xff]  ;;  %v895_v26 = vmax.f32 %v639_v17, 0.0  ;;  %v382_v32 = vld [vmem:[%s5468_s1 + $0x380] sm:$0xff]  ;;  %v897_v35 = vmax.f32 %v641_v21, 0.0  ;;  %v2868_v25 = vcombine.high %v4763_v10, %v4768_v1 }
  0xaa   :  { %2452 = vmatprep.mubr.bf16.mxu0 %v2860_v31  ;;  %2150 = vmatpush1.bf16.msra.mxu1 %v1092_v57  ;;  %v1156_v20 = vpack.c.bf16 %v1020_v15, %v1018_v11  ;;  %v769_v6 = vadd.f32 %v513_v22, %v257_v19  ;;  %v384_v33 = vld [vmem:[%s5468_s1 + $0x390] sm:$0xff]  ;;  %v254_v34 = vld [vmem:[%s5467_s0 + $0x780] sm:$0xff]  ;;  %v638_v37 = vadd.f32 %v382_v32, %v126_v28  ;;  %v131_v51 = vld [vmem:[%s5467_s0 + $0x3a8] sm:$0xff] }
  0xab   :  { %v1023_v36 = vmax.f32 %v767_v23, 0.0  ;;  %v640_v38 = vadd.f32 %v384_v33, %v128_v29  ;;  %v256_v40 = vld [vmem:[%s5467_s0 + $0x790] sm:$0xff]  ;;  %v510_v42 = vld [vmem:[%s5468_s1 + $0x780] sm:$0xff]  ;;  %v1095_v39 = vpack.c.bf16 %v897_v35, %v895_v26  ;;  %v133_v45 = vld [vmem:[%s5467_s0 + $0x3b8] sm:$0xff]  ;;  %v2863_v58 = vcombine.low %v4750_v3, %v4755_v4 }
  0xac   :  { %v512_v24 = vld [vmem:[%s5468_s1 + $0x790] sm:$0xff]  ;;  %2536 = vmatpush1.bf16.msra.mxu0 %v1156_v20  ;;  %v1025_v43 = vmax.f32 %v769_v6, 0.0  ;;  %v766_v44 = vadd.f32 %v510_v42, %v254_v34  ;;  %v4826_v48 = vld [vmem:[%s5469_s2 + $0x300] sm:$0xff]  ;;  %v894_v47 = vmax.f32 %v638_v37, 0.0  ;;  %v387_v52 = vld [vmem:[%s5468_s1 + $0x3a8] sm:$0xff]  ;;  %v2867_v17 = vcombine.low %v4763_v10, %v4768_v1 }
  0xad   :  { %v768_v41 = vadd.f32 %v512_v24, %v256_v40  ;;  %v4831_v49 = vld [vmem:[%s5469_s2 + $0x320] sm:$0xff]  ;;  %v896_v50 = vmax.f32 %v640_v38, 0.0  ;;  %v389_v53 = vld [vmem:[%s5468_s1 + $0x3b8] sm:$0xff]  ;;  %v259_v54 = vld [vmem:[%s5467_s0 + $0x7a8] sm:$0xff]  ;;  %2151 = vmatprep.subr.bf16.mxu1 %v1095_v39  ;;  %v643_v62 = vadd.f32 %v387_v52, %v131_v51 }
  0xae   :  { %v1159_v30 = vpack.c.bf16 %v1025_v43, %v1023_v36  ;;  %v1022_v31 = vmax.f32 %v766_v44, 0.0  ;;  %v4851_v59 = vld [vmem:[%s5469_s2 + $0x310] sm:$0xff]  ;;  %v261_v63 = vld [vmem:[%s5467_s0 + $0x7b8] sm:$0xff]  ;;  %v515_v0 = vld [vmem:[%s5468_s1 + $0x7a8] sm:$0xff]  ;;  %v645_v8 = vadd.f32 %v389_v53, %v133_v45  ;;  %v2872_v18 = vcombine.high %v4826_v48, %v4831_v49 }
  0xaf   :  { %2067 = vmatmul.mubr.bf16.gmra.mrb[40].mxu1 %v2855_v27  ;;  %v1024_v46 = vmax.f32 %v768_v41, 0.0  ;;  %v4856_v60 = vld [vmem:[%s5469_s2 + $0x330] sm:$0xff]  ;;  %v1094_v61 = vpack.c.bf16 %v896_v50, %v894_v47  ;;  %v517_v55 = vld [vmem:[%s5468_s1 + $0x7b8] sm:$0xff]  ;;  %v130_v9 = vld [vmem:[%s5467_s0 + $0x3a0] sm:$0xff]  ;;  %v899_v12 = vmax.f32 %v643_v62, 0.0  ;;  %v771_v13 = vadd.f32 %v515_v0, %v259_v54 }
  0xb0   :  { %2076 = vmatprep.mubr.bf16.mxu1 %v2864_v56  ;;  %2537 = vmatprep.subr.bf16.mxu0 %v1159_v30  ;;  %v132_v2 = vld [vmem:[%s5467_s0 + $0x3b0] sm:$0xff]  ;;  %v386_v11 = vld [vmem:[%s5468_s1 + $0x3a0] sm:$0xff]  ;;  %v773_v14 = vadd.f32 %v517_v55, %v261_v63  ;;  %v901_v19 = vmax.f32 %v645_v8, 0.0  ;;  %v2876_v10 = vcombine.high %v4851_v59, %v4856_v60  ;;  %v135_v20 = vld [vmem:[%s5467_s0 + $0x3c8] sm:$0xff]  ;;  %v2871_v39 = vcombine.low %v4826_v48, %v4831_v49 }
  0xb1   :  { %2453 = vmatmul.mubr.bf16.gmra.mrb[40].mxu0 %v2859_v16  ;;  %v1158_v5 = vpack.c.bf16 %v1024_v46, %v1022_v31  ;;  %2152 = vmatpush1.bf16.msra.mxu1 %v1094_v61  ;;  %v388_v3 = vld [vmem:[%s5468_s1 + $0x3b0] sm:$0xff]  ;;  %v642_v4 = vadd.f32 %v386_v11, %v130_v9  ;;  %v258_v57 = vld [vmem:[%s5467_s0 + $0x7a0] sm:$0xff]  ;;  %v1027_v21 = vmax.f32 %v771_v13, 0.0  ;;  %v137_v26 = vld [vmem:[%s5467_s0 + $0x3d8] sm:$0xff]  ;;  %v2875_v13 = vcombine.low %v4851_v59, %v4856_v60 }
  0xb2   :  { %2462 = vmatprep.mubr.bf16.mxu0 %v2868_v25  ;;  %v260_v15 = vld [vmem:[%s5467_s0 + $0x7b0] sm:$0xff]  ;;  %v644_v7 = vadd.f32 %v388_v3, %v132_v2  ;;  %v514_v27 = vld [vmem:[%s5468_s1 + $0x7a0] sm:$0xff]  ;;  %v1029_v22 = vmax.f32 %v773_v14, 0.0  ;;  %v1097_v1 = vpack.c.bf16 %v901_v19, %v899_v12  ;;  %v391_v6 = vld [vmem:[%s5468_s1 + $0x3c8] sm:$0xff] }
  0xb3   :  { %2538 = vmatpush1.bf16.msra.mxu0 %v1158_v5  ;;  %v516_v16 = vld [vmem:[%s5468_s1 + $0x7b0] sm:$0xff]  ;;  %v898_v23 = vmax.f32 %v642_v4, 0.0  ;;  %v770_v28 = vadd.f32 %v514_v27, %v258_v57  ;;  %v4911_v32 = vld [vmem:[%s5469_s2 + $0x340] sm:$0xff]  ;;  %v393_v36 = vld [vmem:[%s5468_s1 + $0x3d8] sm:$0xff]  ;;  %v647_v24 = vadd.f32 %v391_v6, %v135_v20 }
  0xb4   :  { %v900_v29 = vmax.f32 %v644_v7, 0.0  ;;  %v772_v56 = vadd.f32 %v516_v16, %v260_v15  ;;  %v4916_v33 = vld [vmem:[%s5469_s2 + $0x360] sm:$0xff]  ;;  %v1161_v34 = vpack.c.bf16 %v1029_v22, %v1027_v21  ;;  %v263_v37 = vld [vmem:[%s5467_s0 + $0x7c8] sm:$0xff]  ;;  %v265_v38 = vld [vmem:[%s5467_s0 + $0x7d8] sm:$0xff]  ;;  %2153 = vmatprep.subr.bf16.mxu1 %v1097_v1  ;;  %v649_v25 = vadd.f32 %v393_v36, %v137_v26 }
  0xb5   :  { %v1026_v35 = vmax.f32 %v770_v28, 0.0  ;;  %v519_v43 = vld [vmem:[%s5468_s1 + $0x7c8] sm:$0xff]  ;;  %v521_v44 = vld [vmem:[%s5468_s1 + $0x7d8] sm:$0xff]  ;;  %v134_v41 = vld [vmem:[%s5467_s0 + $0x3c0] sm:$0xff]  ;;  %v903_v46 = vmax.f32 %v647_v24, 0.0  ;;  %v2880_v8 = vcombine.high %v4911_v32, %v4916_v33 }
  0xb6   :  { %v1096_v40 = vpack.c.bf16 %v900_v29, %v898_v23  ;;  %v1028_v42 = vmax.f32 %v772_v56, 0.0  ;;  %2539 = vmatprep.subr.bf16.mxu0 %v1161_v34  ;;  %v775_v47 = vadd.f32 %v519_v43, %v263_v37  ;;  %v777_v50 = vadd.f32 %v521_v44, %v265_v38  ;;  %v136_v51 = vld [vmem:[%s5467_s0 + $0x3d0] sm:$0xff]  ;;  %v390_v45 = vld [vmem:[%s5468_s1 + $0x3c0] sm:$0xff]  ;;  %v139_v12 = vld [vmem:[%s5467_s0 + $0x3e8] sm:$0xff] }
  0xb7   :  { %2077 = vmatmul.mubr.bf16.gmra.mrb[44].mxu1 %v2863_v58  ;;  %v392_v30 = vld [vmem:[%s5468_s1 + $0x3d0] sm:$0xff]  ;;  %v905_v48 = vmax.f32 %v649_v25, 0.0  ;;  %v646_v49 = vadd.f32 %v390_v45, %v134_v41  ;;  %v262_v52 = vld [vmem:[%s5467_s0 + $0x7c0] sm:$0xff]  ;;  %v141_v57 = vld [vmem:[%s5467_s0 + $0x3f8] sm:$0xff] }
  0xb8   :  { %2086 = vmatprep.mubr.bf16.mxu1 %v2872_v18  ;;  %2154 = vmatpush1.bf16.msra.mxu1 %v1096_v40  ;;  %v1160_v31 = vpack.c.bf16 %v1028_v42, %v1026_v35  ;;  %v264_v53 = vld [vmem:[%s5467_s0 + $0x7d0] sm:$0xff]  ;;  %v518_v54 = vld [vmem:[%s5468_s1 + $0x7c0] sm:$0xff]  ;;  %v1031_v63 = vmax.f32 %v775_v47, 0.0  ;;  %v1033_v0 = vmax.f32 %v777_v50, 0.0  ;;  %v648_v55 = vadd.f32 %v392_v30, %v136_v51  ;;  %v395_v15 = vld [vmem:[%s5468_s1 + $0x3e8] sm:$0xff] }
  0xb9   :  { %2463 = vmatmul.mubr.bf16.gmra.mrb[44].mxu0 %v2867_v17  ;;  %v4959_v61 = vld [vmem:[%s5469_s2 + $0x350] sm:$0xff]  ;;  %v774_v5 = vadd.f32 %v518_v54, %v262_v52  ;;  %v1099_v9 = vpack.c.bf16 %v905_v48, %v903_v46  ;;  %v902_v2 = vmax.f32 %v646_v49, 0.0  ;;  %v397_v17 = vld [vmem:[%s5468_s1 + $0x3f8] sm:$0xff]  ;;  %v651_v60 = vadd.f32 %v395_v15, %v139_v12  ;;  %v267_v7 = vld [vmem:[%s5467_s0 + $0x7e8] sm:$0xff] }
  0xba   :  { %2472 = vmatprep.mubr.bf16.mxu0 %v2876_v10  ;;  %v4964_v62 = vld [vmem:[%s5469_s2 + $0x370] sm:$0xff]  ;;  %2540 = vmatpush1.bf16.msra.mxu0 %v1160_v31  ;;  %v1163_v14 = vpack.c.bf16 %v1033_v0, %v1031_v63  ;;  %v904_v3 = vmax.f32 %v648_v55, 0.0  ;;  %v653_v19 = vadd.f32 %v397_v17, %v141_v57  ;;  %v269_v27 = vld [vmem:[%s5467_s0 + $0x7f8] sm:$0xff]  ;;  %v523_v16 = vld [vmem:[%s5468_s1 + $0x7e8] sm:$0xff]  ;;  %v2879_v47 = vcombine.low %v4911_v32, %v4916_v33 }
  0xbb   :  { %v520_v58 = vld [vmem:[%s5468_s1 + $0x7d0] sm:$0xff]  ;;  %v1030_v4 = vmax.f32 %v774_v5, 0.0  ;;  %v2884_v18 = vcombine.high %v4959_v61, %v4964_v62  ;;  %2155 = vmatprep.subr.bf16.mxu1 %v1099_v9  ;;  %v1278_v21 = vld [vmem:[%s5469_s2 + $0x380] sm:$0xff]  ;;  %v525_v28 = vld [vmem:[%s5468_s1 + $0x7f8] sm:$0xff]  ;;  %v779_v10 = vadd.f32 %v523_v16, %v267_v7  ;;  %v907_v20 = vmax.f32 %v651_v60, 0.0 }
  0xbc   :  { %v776_v11 = vadd.f32 %v520_v58, %v264_v53  ;;  %v1282_v22 = vld [vmem:[%s5469_s2 + $0x3a0] sm:$0xff]  ;;  %2541 = vmatprep.subr.bf16.mxu0 %v1163_v14  ;;  %v1098_v23 = vpack.c.bf16 %v904_v3, %v902_v2  ;;  %v140_v29 = vld [vmem:[%s5467_s0 + $0x3f0] sm:$0xff]  ;;  %v909_v26 = vmax.f32 %v653_v19, 0.0  ;;  %v781_v6 = vadd.f32 %v525_v28, %v269_v27  ;;  %v1171_v9 = vld [vmem:[%s5469_s2 + $0x28] sm:$0xff] }
  0xbd   :  { %v138_v1 = vld [vmem:[%s5467_s0 + $0x3e0] sm:$0xff]  ;;  %v396_v35 = vld [vmem:[%s5468_s1 + $0x3f0] sm:$0xff]  ;;  %v1035_v37 = vmax.f32 %v779_v10, 0.0  ;;  %v2888_v31 = vcombine.high %v1278_v21, %v1282_v22  ;;  %v2883_v52 = vcombine.low %v4959_v61, %v4964_v62  ;;  %v2887_v0 = vcombine.low %v1278_v21, %v1282_v22  ;;  %v1173_v12 = vld [vmem:[%s5469_s2 + $0x38] sm:$0xff] }
  0xbe   :  { %v1032_v59 = vmax.f32 %v776_v11, 0.0  ;;  %v394_v34 = vld [vmem:[%s5468_s1 + $0x3e0] sm:$0xff]  ;;  %2156 = vmatpush1.bf16.msra.mxu1 %v1098_v23  ;;  %v652_v40 = vadd.f32 %v396_v35, %v140_v29  ;;  %v268_v42 = vld [vmem:[%s5467_s0 + $0x7f0] sm:$0xff]  ;;  %v1101_v43 = vpack.c.bf16 %v909_v26, %v907_v20  ;;  %v1037_v44 = vmax.f32 %v781_v6, 0.0  ;;  %v1169_v11 = vld [vmem:[%s5469_s2 + $0x18] sm:$0xff] }
  0xbf   :  { %2087 = vmatmul.mubr.bf16.gmra.mrb[48].mxu1 %v2871_v39  ;;  %v266_v36 = vld [vmem:[%s5467_s0 + $0x7e0] sm:$0xff]  ;;  %v650_v38 = vadd.f32 %v394_v34, %v138_v1  ;;  %v524_v25 = vld [vmem:[%s5468_s1 + $0x7f0] sm:$0xff]  ;;  %v2782_v3 = vcombine.high %v1169_v11, %v1173_v12  ;;  %v1179_v57 = vld [vmem:[%s5469_s2 + $0x68] sm:$0xff]  ;;  %v2781_v60 = vcombine.low %v1169_v11, %v1173_v12 }
  0xc0   :  { %2096 = vmatprep.mubr.bf16.mxu1 %v2880_v8  ;;  %v1162_v56 = vpack.c.bf16 %v1032_v59, %v1030_v4  ;;  %v522_v24 = vld [vmem:[%s5468_s1 + $0x7e0] sm:$0xff]  ;;  %v780_v39 = vadd.f32 %v524_v25, %v268_v42  ;;  %v1280_v50 = vld [vmem:[%s5469_s2 + $0x390] sm:$0xff]  ;;  %v908_v30 = vmax.f32 %v652_v40, 0.0  ;;  %2157 = vmatprep.subr.bf16.mxu1 %v1101_v43  ;;  %v1165_v46 = vpack.c.bf16 %v1037_v44, %v1035_v37  ;;  %v1167_v8 = vld [vmem:[%s5469_s2 + $0x8] sm:$0xff] }
  0xc1   :  { %2473 = vmatmul.mubr.bf16.gmra.mrb[48].mxu0 %v2875_v13  ;;  %v778_v41 = vadd.f32 %v522_v24, %v266_v36  ;;  %v1284_v51 = vld [vmem:[%s5469_s2 + $0x3b0] sm:$0xff]  ;;  %v906_v45 = vmax.f32 %v650_v38, 0.0  ;;  %v1286_v54 = vld [vmem:[%s5469_s2 + $0x3c0] sm:$0xff]  ;;  %v2778_v13 = vcombine.high %v1167_v8, %v1171_v9  ;;  %v1175_v4 = vld [vmem:[%s5469_s2 + $0x48] sm:$0xff]  ;;  %v2777_v15 = vcombine.low %v1167_v8, %v1171_v9 }
  0xc2   :  { %2482 = vmatprep.mubr.bf16.mxu0 %v2884_v18  ;;  %2542 = vmatpush1.bf16.msra.mxu0 %v1162_v56  ;;  %v1036_v49 = vmax.f32 %v780_v39, 0.0  ;;  %v2892_v32 = vcombine.high %v1280_v50, %v1284_v51  ;;  %v1290_v63 = vld [vmem:[%s5469_s2 + $0x3e0] sm:$0xff]  ;;  %v1288_v61 = vld [vmem:[%s5469_s2 + $0x3d0] sm:$0xff]  ;;  %v2891_v58 = vcombine.low %v1280_v50, %v1284_v51  ;;  %v1177_v17 = vld [vmem:[%s5469_s2 + $0x58] sm:$0xff]  ;;  %v2786_v59 = vcombine.high %v1175_v4, %v1179_v57 }
  0xc3   :  { %v1034_v48 = vmax.f32 %v778_v41, 0.0  ;;  %v1100_v53 = vpack.c.bf16 %v908_v30, %v906_v45  ;;  %2543 = vmatprep.subr.bf16.mxu0 %v1165_v46  ;;  %v1292_v62 = vld [vmem:[%s5469_s2 + $0x3f0] sm:$0xff]  ;;  %v2896_v55 = vcombine.high %v1286_v54, %v1290_v63  ;;  %v2895_v2 = vcombine.low %v1286_v54, %v1290_v63  ;;  %v1181_v18 = vld [vmem:[%s5469_s2 + $0x78] sm:$0xff]  ;;  %v1183_v7 = vld [vmem:[%s5469_s2 + $0x88] sm:$0xff] }
  0xc4   :  { %v2900_v5 = vcombine.high %v1288_v61, %v1292_v62  ;;  %v2899_v14 = vcombine.low %v1288_v61, %v1292_v62  ;;  %v2790_v19 = vcombine.high %v1177_v17, %v1181_v18  ;;  %v1187_v27 = vld [vmem:[%s5469_s2 + $0xa8] sm:$0xff]  ;;  %v2785_v16 = vcombine.low %v1175_v4, %v1179_v57  ;;  %v1185_v21 = vld [vmem:[%s5469_s2 + $0x98] sm:$0xff] }
  0xc5   :  { %v1164_v33 = vpack.c.bf16 %v1036_v49, %v1034_v48  ;;  %2158 = vmatpush1.bf16.msra.mxu1 %v1100_v53  ;;  %v1189_v22 = vld [vmem:[%s5469_s2 + $0xb8] sm:$0xff]  ;;  %v2794_v23 = vcombine.high %v1183_v7, %v1187_v27  ;;  %v2789_v28 = vcombine.low %v1177_v17, %v1181_v18  ;;  %v1191_v1 = vld [vmem:[%s5469_s2 + $0xc8] sm:$0xff]  ;;  %v2793_v56 = vcombine.low %v1183_v7, %v1187_v27 }
  0xc6   :  { %v2798_v10 = vcombine.high %v1185_v21, %v1189_v22  ;;  %v1195_v29 = vld [vmem:[%s5469_s2 + $0xe8] sm:$0xff]  ;;  %v1193_v20 = vld [vmem:[%s5469_s2 + $0xd8] sm:$0xff]  ;;  %v2797_v34 = vcombine.low %v1185_v21, %v1189_v22 }
  0xc7   :  { %2097 = vmatmul.mubr.bf16.gmra.mrb[52].mxu1 %v2879_v47  ;;  %2544 = vmatpush1.bf16.msra.mxu0 %v1164_v33  ;;  %v1197_v26 = vld [vmem:[%s5469_s2 + $0xf8] sm:$0xff]  ;;  %v2802_v6 = vcombine.high %v1191_v1, %v1195_v29  ;;  %v1199_v36 = vld [vmem:[%s5469_s2 + $0x108] sm:$0xff]  ;;  %v2801_v38 = vcombine.low %v1191_v1, %v1195_v29 }
  0xc8   :  { %2106 = vmatprep.mubr.bf16.mxu1 %v2888_v31  ;;  %v2806_v35 = vcombine.high %v1193_v20, %v1197_v26  ;;  %v1203_v37 = vld [vmem:[%s5469_s2 + $0x128] sm:$0xff]  ;;  %v1201_v40 = vld [vmem:[%s5469_s2 + $0x118] sm:$0xff]  ;;  %v2805_v25 = vcombine.low %v1193_v20, %v1197_v26 }
  0xc9   :  { %2483 = vmatmul.mubr.bf16.gmra.mrb[52].mxu0 %v2883_v52  ;;  %v1205_v42 = vld [vmem:[%s5469_s2 + $0x138] sm:$0xff]  ;;  %v2810_v24 = vcombine.high %v1199_v36, %v1203_v37  ;;  %v1207_v44 = vld [vmem:[%s5469_s2 + $0x148] sm:$0xff]  ;;  %v2809_v39 = vcombine.low %v1199_v36, %v1203_v37 }
  0xca   :  { %2492 = vmatprep.mubr.bf16.mxu0 %v2892_v32  ;;  %v2814_v43 = vcombine.high %v1201_v40, %v1205_v42  ;;  %v1211_v41 = vld [vmem:[%s5469_s2 + $0x168] sm:$0xff]  ;;  %v1209_v47 = vld [vmem:[%s5469_s2 + $0x158] sm:$0xff]  ;;  %v2813_v45 = vcombine.low %v1201_v40, %v1205_v42 }
  0xcb   :  { %v1213_v50 = vld [vmem:[%s5469_s2 + $0x178] sm:$0xff]  ;;  %v2818_v51 = vcombine.high %v1207_v44, %v1211_v41  ;;  %v1215_v31 = vld [vmem:[%s5469_s2 + $0x188] sm:$0xff]  ;;  %v2817_v48 = vcombine.low %v1207_v44, %v1211_v41 }
  0xcc   :  { %v2822_v30 = vcombine.high %v1209_v47, %v1213_v50  ;;  %v1219_v46 = vld [vmem:[%s5469_s2 + $0x1a8] sm:$0xff]  ;;  %v1217_v49 = vld [vmem:[%s5469_s2 + $0x198] sm:$0xff]  ;;  %v2821_v32 = vcombine.low %v1209_v47, %v1213_v50 }
  0xcd   :  { %v1221_v52 = vld [vmem:[%s5469_s2 + $0x1b8] sm:$0xff]  ;;  %v2826_v53 = vcombine.high %v1215_v31, %v1219_v46  ;;  %v1223_v54 = vld [vmem:[%s5469_s2 + $0x1c8] sm:$0xff] }
  0xce   :  { %v2830_v33 = vcombine.high %v1217_v49, %v1221_v52  ;;  %v1227_v63 = vld [vmem:[%s5469_s2 + $0x1e8] sm:$0xff]  ;;  %v1225_v61 = vld [vmem:[%s5469_s2 + $0x1d8] sm:$0xff] }
  0xcf   :  { %2107 = vmatmul.mubr.bf16.gmra.mrb[56].mxu1 %v2887_v0  ;;  %v2825_v0 = vcombine.low %v1215_v31, %v1219_v46  ;;  %v1229_v62 = vld [vmem:[%s5469_s2 + $0x1f8] sm:$0xff]  ;;  %v1231_v8 = vld [vmem:[%s5469_s2 + $0x208] sm:$0xff] }
  0xd0   :  { %2116 = vmatprep.mubr.bf16.mxu1 %v2896_v55  ;;  %v2834_v55 = vcombine.high %v1223_v54, %v1227_v63  ;;  %v1235_v9 = vld [vmem:[%s5469_s2 + $0x228] sm:$0xff]  ;;  %v1233_v11 = vld [vmem:[%s5469_s2 + $0x218] sm:$0xff] }
  0xd1   :  { %2493 = vmatmul.mubr.bf16.gmra.mrb[56].mxu0 %v2891_v58  ;;  %v2829_v58 = vcombine.low %v1217_v49, %v1221_v52  ;;  %v1237_v12 = vld [vmem:[%s5469_s2 + $0x238] sm:$0xff]  ;;  %v1239_v4 = vld [vmem:[%s5469_s2 + $0x248] sm:$0xff] }
  0xd2   :  { %2502 = vmatprep.mubr.bf16.mxu0 %v2900_v5  ;;  %v2838_v5 = vcombine.high %v1225_v61, %v1229_v62  ;;  %v1243_v57 = vld [vmem:[%s5469_s2 + $0x268] sm:$0xff]  ;;  %v1241_v17 = vld [vmem:[%s5469_s2 + $0x258] sm:$0xff] }
  0xd3   :  { %v1245_v18 = vld [vmem:[%s5469_s2 + $0x278] sm:$0xff]  ;;  %v1247_v7 = vld [vmem:[%s5469_s2 + $0x288] sm:$0xff] }
  0xd4   :  { %v1251_v27 = vld [vmem:[%s5469_s2 + $0x2a8] sm:$0xff]  ;;  %v1249_v21 = vld [vmem:[%s5469_s2 + $0x298] sm:$0xff] }
  0xd5   :  { %v1253_v22 = vld [vmem:[%s5469_s2 + $0x2b8] sm:$0xff]  ;;  %v1255_v1 = vld [vmem:[%s5469_s2 + $0x2c8] sm:$0xff] }
  0xd6   :  { %v1259_v29 = vld [vmem:[%s5469_s2 + $0x2e8] sm:$0xff]  ;;  %v1257_v20 = vld [vmem:[%s5469_s2 + $0x2d8] sm:$0xff] }
  0xd7   :  { %2117 = vmatmul.mubr.bf16.gmra.mrb[60].mxu1 %v2895_v2  ;;  %v2833_v2 = vcombine.low %v1223_v54, %v1227_v63  ;;  %v1261_v26 = vld [vmem:[%s5469_s2 + $0x2f8] sm:$0xff]  ;;  %v1263_v36 = vld [vmem:[%s5469_s2 + $0x308] sm:$0xff] }
  0xd8   :  { %2159 = vmatprep.mubr.bf16.mxu1 %v2778_v13  ;;  %v2842_v13 = vcombine.high %v1231_v8, %v1235_v9  ;;  %v1267_v37 = vld [vmem:[%s5469_s2 + $0x328] sm:$0xff]  ;;  %v1265_v40 = vld [vmem:[%s5469_s2 + $0x318] sm:$0xff] }
  0xd9   :  { %2503 = vmatmul.mubr.bf16.gmra.mrb[60].mxu0 %v2899_v14  ;;  %v2837_v14 = vcombine.low %v1225_v61, %v1229_v62  ;;  %v1269_v42 = vld [vmem:[%s5469_s2 + $0x338] sm:$0xff]  ;;  %v1271_v44 = vld [vmem:[%s5469_s2 + $0x348] sm:$0xff] }
  0xda   :  { %2545 = vmatprep.mubr.bf16.mxu0 %v2782_v3  ;;  %v2846_v3 = vcombine.high %v1233_v11, %v1237_v12  ;;  %v1275_v41 = vld [vmem:[%s5469_s2 + $0x368] sm:$0xff]  ;;  %v1273_v47 = vld [vmem:[%s5469_s2 + $0x358] sm:$0xff] }
  0xdb   :  { %v1277_v50 = vld [vmem:[%s5469_s2 + $0x378] sm:$0xff]  ;;  %v1279_v31 = vld [vmem:[%s5469_s2 + $0x388] sm:$0xff] }
  0xdc   :  { %v1283_v46 = vld [vmem:[%s5469_s2 + $0x3a8] sm:$0xff]  ;;  %v1281_v49 = vld [vmem:[%s5469_s2 + $0x398] sm:$0xff] }
  0xdd   :  { %v1285_v52 = vld [vmem:[%s5469_s2 + $0x3b8] sm:$0xff]  ;;  %v1287_v54 = vld [vmem:[%s5469_s2 + $0x3c8] sm:$0xff] }
  0xde   :  { %v1291_v63 = vld [vmem:[%s5469_s2 + $0x3e8] sm:$0xff]  ;;  %v1289_v61 = vld [vmem:[%s5469_s2 + $0x3d8] sm:$0xff] }
  0xdf   :  { %2160 = vmatmul.mubr.bf16.vlgmr.msra.gmra.mrb[0].mxu1 %v2777_v15  ;;  %v2841_v15 = vcombine.low %v1231_v8, %v1235_v9  ;;  %v1293_v62 = vld [vmem:[%s5469_s2 + $0x3f8] sm:$0xff]  ;;  %v2897_v8 = vcombine.low %v1287_v54, %v1291_v63 }
  0xe0   :  { %2169 = vmatprep.mubr.bf16.mxu1 %v2786_v59  ;;  %v2850_v59 = vcombine.high %v1239_v4, %v1243_v57  ;;  %v2901_v9 = vcombine.low %v1289_v61, %v1293_v62 }
  0xe1   :  { %2546 = vmatmul.mubr.bf16.vlgmr.msra.gmra.mrb[0].mxu0 %v2781_v60  ;;  %v2845_v60 = vcombine.low %v1233_v11, %v1237_v12 }
  0xe2   :  { %2555 = vmatprep.mubr.bf16.mxu0 %v2790_v19  ;;  %v2854_v19 = vcombine.high %v1241_v17, %v1245_v18 }
  0xe7   :  { %2170 = vmatmul.mubr.bf16.gmra.mrb[4].mxu1 %v2785_v16  ;;  %v2849_v16 = vcombine.low %v1239_v4, %v1243_v57 }
  0xe8   :  { %2179 = vmatprep.mubr.bf16.mxu1 %v2794_v23  ;;  %v2858_v23 = vcombine.high %v1247_v7, %v1251_v27 }
  0xe9   :  { %2556 = vmatmul.mubr.bf16.gmra.mrb[4].mxu0 %v2789_v28  ;;  %v2853_v28 = vcombine.low %v1241_v17, %v1245_v18 }
  0xea   :  { %2565 = vmatprep.mubr.bf16.mxu0 %v2798_v10  ;;  %v2862_v10 = vcombine.high %v1249_v21, %v1253_v22 }
  0xef   :  { %2180 = vmatmul.mubr.bf16.gmra.mrb[8].mxu1 %v2793_v56  ;;  %v2857_v56 = vcombine.low %v1247_v7, %v1251_v27 }
  0xf0   :  { %2189 = vmatprep.mubr.bf16.mxu1 %v2802_v6  ;;  %v2866_v6 = vcombine.high %v1255_v1, %v1259_v29 }
  0xf1   :  { %2566 = vmatmul.mubr.bf16.gmra.mrb[8].mxu0 %v2797_v34  ;;  %v2861_v34 = vcombine.low %v1249_v21, %v1253_v22 }
  0xf2   :  { %2575 = vmatprep.mubr.bf16.mxu0 %v2806_v35  ;;  %v2870_v35 = vcombine.high %v1257_v20, %v1261_v26 }
  0xf7   :  { %2190 = vmatmul.mubr.bf16.gmra.mrb[12].mxu1 %v2801_v38  ;;  %v2865_v38 = vcombine.low %v1255_v1, %v1259_v29 }
  0xf8   :  { %2199 = vmatprep.mubr.bf16.mxu1 %v2810_v24  ;;  %v2874_v24 = vcombine.high %v1263_v36, %v1267_v37 }
  0xf9   :  { %2576 = vmatmul.mubr.bf16.gmra.mrb[12].mxu0 %v2805_v25  ;;  %v2869_v25 = vcombine.low %v1257_v20, %v1261_v26 }
  0xfa   :  { %2585 = vmatprep.mubr.bf16.mxu0 %v2814_v43  ;;  %v2878_v43 = vcombine.high %v1265_v40, %v1269_v42 }
  0xff   :  { %2200 = vmatmul.mubr.bf16.gmra.mrb[16].mxu1 %v2809_v39  ;;  %v2873_v39 = vcombine.low %v1263_v36, %v1267_v37 }
 0x100   :  { %2209 = vmatprep.mubr.bf16.mxu1 %v2818_v51  ;;  %v2882_v51 = vcombine.high %v1271_v44, %v1275_v41 }
 0x101   :  { %2586 = vmatmul.mubr.bf16.gmra.mrb[16].mxu0 %v2813_v45  ;;  %v2877_v45 = vcombine.low %v1265_v40, %v1269_v42 }
 0x102   :  { %2595 = vmatprep.mubr.bf16.mxu0 %v2822_v30  ;;  %v2886_v30 = vcombine.high %v1273_v47, %v1277_v50 }
 0x107   :  { %2210 = vmatmul.mubr.bf16.gmra.mrb[20].mxu1 %v2817_v48  ;;  %v2881_v48 = vcombine.low %v1271_v44, %v1275_v41 }
 0x108   :  { %2219 = vmatprep.mubr.bf16.mxu1 %v2826_v53  ;;  %v2890_v53 = vcombine.high %v1279_v31, %v1283_v46 }
 0x109   :  { %2596 = vmatmul.mubr.bf16.gmra.mrb[20].mxu0 %v2821_v32  ;;  %v2885_v32 = vcombine.low %v1273_v47, %v1277_v50 }
 0x10a   :  { %2605 = vmatprep.mubr.bf16.mxu0 %v2830_v33  ;;  %v2894_v33 = vcombine.high %v1281_v49, %v1285_v52 }
 0x10f   :  { %2220 = vmatmul.mubr.bf16.gmra.mrb[24].mxu1 %v2825_v0  ;;  %v2889_v0 = vcombine.low %v1279_v31, %v1283_v46 }
 0x110   :  { %2229 = vmatprep.mubr.bf16.mxu1 %v2834_v55  ;;  %v2898_v55 = vcombine.high %v1287_v54, %v1291_v63 }
 0x111   :  { %2606 = vmatmul.mubr.bf16.gmra.mrb[24].mxu0 %v2829_v58  ;;  %v2893_v58 = vcombine.low %v1281_v49, %v1285_v52 }
 0x112   :  { %2615 = vmatprep.mubr.bf16.mxu0 %v2838_v5  ;;  %v2902_v5 = vcombine.high %v1289_v61, %v1293_v62 }
 0x117   :  { %2230 = vmatmul.mubr.bf16.gmra.mrb[28].mxu1 %v2833_v2 }
 0x118   :  { %2239 = vmatprep.mubr.bf16.mxu1 %v2842_v13 }
 0x119   :  { %2616 = vmatmul.mubr.bf16.gmra.mrb[28].mxu0 %v2837_v14 }
 0x11a   :  { %2625 = vmatprep.mubr.bf16.mxu0 %v2846_v3 }
 0x11f   :  { %2240 = vmatmul.mubr.bf16.gmra.mrb[32].mxu1 %v2841_v15 }
 0x120   :  { %2249 = vmatprep.mubr.bf16.mxu1 %v2850_v59 }
 0x121   :  { %2626 = vmatmul.mubr.bf16.gmra.mrb[32].mxu0 %v2845_v60 }
 0x122   :  { %2635 = vmatprep.mubr.bf16.mxu0 %v2854_v19 }
 0x127   :  { %2250 = vmatmul.mubr.bf16.gmra.mrb[36].mxu1 %v2849_v16 }
 0x128   :  { %2259 = vmatprep.mubr.bf16.mxu1 %v2858_v23 }
 0x129   :  { %2636 = vmatmul.mubr.bf16.gmra.mrb[36].mxu0 %v2853_v28 }
 0x12a   :  { %2645 = vmatprep.mubr.bf16.mxu0 %v2862_v10 }
 0x12f   :  { %2260 = vmatmul.mubr.bf16.gmra.mrb[40].mxu1 %v2857_v56 }
 0x130   :  { %2269 = vmatprep.mubr.bf16.mxu1 %v2866_v6 }
 0x131   :  { %2646 = vmatmul.mubr.bf16.gmra.mrb[40].mxu0 %v2861_v34 }
 0x132   :  { %2655 = vmatprep.mubr.bf16.mxu0 %v2870_v35 }
 0x137   :  { %2270 = vmatmul.mubr.bf16.gmra.mrb[44].mxu1 %v2865_v38 }
 0x138   :  { %2279 = vmatprep.mubr.bf16.mxu1 %v2874_v24 }
 0x139   :  { %2656 = vmatmul.mubr.bf16.gmra.mrb[44].mxu0 %v2869_v25 }
 0x13a   :  { %2665 = vmatprep.mubr.bf16.mxu0 %v2878_v43 }
 0x13f   :  { %2280 = vmatmul.mubr.bf16.gmra.mrb[48].mxu1 %v2873_v39 }
 0x140   :  { %2289 = vmatprep.mubr.bf16.mxu1 %v2882_v51 }
 0x141   :  { %2666 = vmatmul.mubr.bf16.gmra.mrb[48].mxu0 %v2877_v45 }
 0x142   :  { %2675 = vmatprep.mubr.bf16.mxu0 %v2886_v30 }
 0x147   :  { %2290 = vmatmul.mubr.bf16.gmra.mrb[52].mxu1 %v2881_v48 }
 0x148   :  { %2299 = vmatprep.mubr.bf16.mxu1 %v2890_v53 }
 0x149   :  { %2676 = vmatmul.mubr.bf16.gmra.mrb[52].mxu0 %v2885_v32 }
 0x14a   :  { %2685 = vmatprep.mubr.bf16.mxu0 %v2894_v33 }
 0x14f   :  { %2300 = vmatmul.mubr.bf16.gmra.mrb[56].mxu1 %v2889_v0 }
 0x150   :  { %2309 = vmatprep.mubr.bf16.mxu1 %v2898_v55 }
 0x151   :  { %2686 = vmatmul.mubr.bf16.gmra.mrb[56].mxu0 %v2893_v58 }
 0x152   :  { %2695 = vmatprep.mubr.bf16.mxu0 %v2902_v5 }
 0x157   :  { %2310 = vmatmul.mubr.bf16.gmra.mrb[60].mxu1 %v2897_v8 }
 0x159   :  { %2696 = vmatmul.mubr.bf16.gmra.mrb[60].mxu0 %v2901_v9 }
 0x1b2   :  { %v2161_v2 = vpop.f32.mrb[0].mxu1 }
 0x1b3   :  { %v2163_v11 = vpop.f32.mrb[1].mxu1 }
 0x1b4   :  { %v2547_v12 = vpop.f32.mrb[0].mxu0  ;;  %v2165_v13 = vpop.f32.mrb[2].mxu1 }
 0x1b5   :  { %v2903_v14 = vadd.f32 %v2547_v12, %v2161_v2  ;;  %v2549_v3 = vpop.f32.mrb[1].mxu0  ;;  %v2167_v4 = vpop.f32.mrb[3].mxu1 }
 0x1b6   :  { %v2904_v57 = vadd.f32 %v2549_v3, %v2163_v11  ;;  %v2551_v15 = vpop.f32.mrb[2].mxu0 }
 0x1b7   :  { %2706 = vst [vmem:[%s5470_s3] sm:$0xff] %v2903_v14  ;;  %v2905_v17 = vadd.f32 %v2551_v15, %v2165_v13  ;;  %v2553_v18 = vpop.f32.mrb[3].mxu0 }
 0x1b8   :  { %2708 = vst.msk [vmem:[%s5470_s3 + $0x8] sm:$0xff] %vm2707_vm0, %v2904_v57  ;;  %v2906_v59 = vadd.f32 %v2553_v18, %v2167_v4 }
 0x1b9   :  { %2709 = vst [vmem:[%s5470_s3 + $0x10] sm:$0xff] %v2905_v17 }
 0x1ba   :  { %2710 = vst.msk [vmem:[%s5470_s3 + $0x18] sm:$0xff] %vm2707_vm0, %v2906_v59  ;;  %v2171_v60 = vpop.f32.mrb[4].mxu1 }
 0x1bb   :  { %v2173_v19 = vpop.f32.mrb[5].mxu1 }
 0x1bc   :  { %v2557_v7 = vpop.f32.mrb[4].mxu0  ;;  %v2175_v27 = vpop.f32.mrb[6].mxu1 }
 0x1bd   :  { %v2907_v16 = vadd.f32 %v2557_v7, %v2171_v60  ;;  %v2559_v21 = vpop.f32.mrb[5].mxu0  ;;  %v2177_v22 = vpop.f32.mrb[7].mxu1 }
 0x1be   :  { %v2908_v23 = vadd.f32 %v2559_v21, %v2173_v19  ;;  %v2561_v28 = vpop.f32.mrb[6].mxu0 }
 0x1bf   :  { %2711 = vst [vmem:[%s5470_s3 + $0x20] sm:$0xff] %v2907_v16  ;;  %v2909_v10 = vadd.f32 %v2561_v28, %v2175_v27  ;;  %v2563_v1 = vpop.f32.mrb[7].mxu0 }
 0x1c0   :  { %2712 = vst.msk [vmem:[%s5470_s3 + $0x28] sm:$0xff] %vm2707_vm0, %v2908_v23  ;;  %v2910_v29 = vadd.f32 %v2563_v1, %v2177_v22 }
 0x1c1   :  { %2713 = vst [vmem:[%s5470_s3 + $0x30] sm:$0xff] %v2909_v10 }
 0x1c2   :  { %2714 = vst.msk [vmem:[%s5470_s3 + $0x38] sm:$0xff] %vm2707_vm0, %v2910_v29  ;;  %v2181_v56 = vpop.f32.mrb[8].mxu1 }
 0x1c3   :  { %v2183_v20 = vpop.f32.mrb[9].mxu1 }
 0x1c4   :  { %v2567_v26 = vpop.f32.mrb[8].mxu0  ;;  %v2185_v6 = vpop.f32.mrb[10].mxu1 }
 0x1c5   :  { %v2911_v34 = vadd.f32 %v2567_v26, %v2181_v56  ;;  %v2569_v35 = vpop.f32.mrb[9].mxu0  ;;  %v2187_v36 = vpop.f32.mrb[11].mxu1 }
 0x1c6   :  { %v2912_v37 = vadd.f32 %v2569_v35, %v2183_v20  ;;  %v2571_v38 = vpop.f32.mrb[10].mxu0 }
 0x1c7   :  { %2715 = vst [vmem:[%s5470_s3 + $0x40] sm:$0xff] %v2911_v34  ;;  %v2913_v40 = vadd.f32 %v2571_v38, %v2185_v6  ;;  %v2573_v42 = vpop.f32.mrb[11].mxu0 }
 0x1c8   :  { %2716 = vst.msk [vmem:[%s5470_s3 + $0x48] sm:$0xff] %vm2707_vm0, %v2912_v37  ;;  %v2914_v24 = vadd.f32 %v2573_v42, %v2187_v36 }
 0x1c9   :  { %2717 = vst [vmem:[%s5470_s3 + $0x50] sm:$0xff] %v2913_v40 }
 0x1ca   :  { %2718 = vst.msk [vmem:[%s5470_s3 + $0x58] sm:$0xff] %vm2707_vm0, %v2914_v24  ;;  %v2191_v25 = vpop.f32.mrb[12].mxu1 }
 0x1cb   :  { %v2193_v43 = vpop.f32.mrb[13].mxu1 }
 0x1cc   :  { %v2577_v44 = vpop.f32.mrb[12].mxu0  ;;  %v2195_v41 = vpop.f32.mrb[14].mxu1 }
 0x1cd   :  { %v2915_v39 = vadd.f32 %v2577_v44, %v2191_v25  ;;  %v2579_v47 = vpop.f32.mrb[13].mxu0  ;;  %v2197_v50 = vpop.f32.mrb[15].mxu1 }
 0x1ce   :  { %v2916_v51 = vadd.f32 %v2579_v47, %v2193_v43  ;;  %v2581_v45 = vpop.f32.mrb[14].mxu0 }
 0x1cf   :  { %2719 = vst [vmem:[%s5470_s3 + $0x60] sm:$0xff] %v2915_v39  ;;  %v2917_v30 = vadd.f32 %v2581_v45, %v2195_v41  ;;  %v2583_v31 = vpop.f32.mrb[15].mxu0 }
 0x1d0   :  { %2720 = vst.msk [vmem:[%s5470_s3 + $0x68] sm:$0xff] %vm2707_vm0, %v2916_v51  ;;  %v2918_v46 = vadd.f32 %v2583_v31, %v2197_v50 }
 0x1d1   :  { %2721 = vst [vmem:[%s5470_s3 + $0x70] sm:$0xff] %v2917_v30 }
 0x1d2   :  { %2722 = vst.msk [vmem:[%s5470_s3 + $0x78] sm:$0xff] %vm2707_vm0, %v2918_v46  ;;  %v2201_v48 = vpop.f32.mrb[16].mxu1 }
 0x1d3   :  { %v2203_v49 = vpop.f32.mrb[17].mxu1 }
 0x1d4   :  { %v2587_v52 = vpop.f32.mrb[16].mxu0  ;;  %v2205_v53 = vpop.f32.mrb[18].mxu1 }
 0x1d5   :  { %v2919_v32 = vadd.f32 %v2587_v52, %v2201_v48  ;;  %v2589_v33 = vpop.f32.mrb[17].mxu0  ;;  %v2207_v54 = vpop.f32.mrb[19].mxu1 }
 0x1d6   :  { %v2920_v63 = vadd.f32 %v2589_v33, %v2203_v49  ;;  %v2591_v0 = vpop.f32.mrb[18].mxu0 }
 0x1d7   :  { %2723 = vst [vmem:[%s5470_s3 + $0x80] sm:$0xff] %v2919_v32  ;;  %v2921_v61 = vadd.f32 %v2591_v0, %v2205_v53  ;;  %v2593_v62 = vpop.f32.mrb[19].mxu0 }
 0x1d8   :  { %2724 = vst.msk [vmem:[%s5470_s3 + $0x88] sm:$0xff] %vm2707_vm0, %v2920_v63  ;;  %v2922_v55 = vadd.f32 %v2593_v62, %v2207_v54 }
 0x1d9   :  { %2725 = vst [vmem:[%s5470_s3 + $0x90] sm:$0xff] %v2921_v61 }
 0x1da   :  { %2726 = vst.msk [vmem:[%s5470_s3 + $0x98] sm:$0xff] %vm2707_vm0, %v2922_v55  ;;  %v2211_v58 = vpop.f32.mrb[20].mxu1 }
 0x1db   :  { %v2213_v5 = vpop.f32.mrb[21].mxu1 }
 0x1dc   :  { %v2597_v8 = vpop.f32.mrb[20].mxu0  ;;  %v2215_v9 = vpop.f32.mrb[22].mxu1 }
 0x1dd   :  { %v2923_v2 = vadd.f32 %v2597_v8, %v2211_v58  ;;  %v2599_v11 = vpop.f32.mrb[21].mxu0  ;;  %v2217_v12 = vpop.f32.mrb[23].mxu1 }
 0x1de   :  { %v2924_v13 = vadd.f32 %v2599_v11, %v2213_v5  ;;  %v2601_v14 = vpop.f32.mrb[22].mxu0 }
 0x1df   :  { %2727 = vst [vmem:[%s5470_s3 + $0xa0] sm:$0xff] %v2923_v2  ;;  %v2925_v3 = vadd.f32 %v2601_v14, %v2215_v9  ;;  %v2603_v4 = vpop.f32.mrb[23].mxu0 }
 0x1e0   :  { %2728 = vst.msk [vmem:[%s5470_s3 + $0xa8] sm:$0xff] %vm2707_vm0, %v2924_v13  ;;  %v2926_v57 = vadd.f32 %v2603_v4, %v2217_v12 }
 0x1e1   :  { %2729 = vst [vmem:[%s5470_s3 + $0xb0] sm:$0xff] %v2925_v3 }
 0x1e2   :  { %2730 = vst.msk [vmem:[%s5470_s3 + $0xb8] sm:$0xff] %vm2707_vm0, %v2926_v57  ;;  %v2221_v15 = vpop.f32.mrb[24].mxu1 }
 0x1e3   :  { %v2223_v17 = vpop.f32.mrb[25].mxu1 }
 0x1e4   :  { %v2607_v18 = vpop.f32.mrb[24].mxu0  ;;  %v2225_v59 = vpop.f32.mrb[26].mxu1 }
 0x1e5   :  { %v2927_v60 = vadd.f32 %v2607_v18, %v2221_v15  ;;  %v2609_v19 = vpop.f32.mrb[25].mxu0  ;;  %v2227_v7 = vpop.f32.mrb[27].mxu1 }
 0x1e6   :  { %v2928_v27 = vadd.f32 %v2609_v19, %v2223_v17  ;;  %v2611_v16 = vpop.f32.mrb[26].mxu0 }
 0x1e7   :  { %2731 = vst [vmem:[%s5470_s3 + $0xc0] sm:$0xff] %v2927_v60  ;;  %v2929_v21 = vadd.f32 %v2611_v16, %v2225_v59  ;;  %v2613_v22 = vpop.f32.mrb[27].mxu0 }
 0x1e8   :  { %2732 = vst.msk [vmem:[%s5470_s3 + $0xc8] sm:$0xff] %vm2707_vm0, %v2928_v27  ;;  %v2930_v23 = vadd.f32 %v2613_v22, %v2227_v7 }
 0x1e9   :  { %2733 = vst [vmem:[%s5470_s3 + $0xd0] sm:$0xff] %v2929_v21 }
 0x1ea   :  { %2734 = vst.msk [vmem:[%s5470_s3 + $0xd8] sm:$0xff] %vm2707_vm0, %v2930_v23  ;;  %v2231_v28 = vpop.f32.mrb[28].mxu1 }
 0x1eb   :  { %v2233_v10 = vpop.f32.mrb[29].mxu1 }
 0x1ec   :  { %v2617_v1 = vpop.f32.mrb[28].mxu0  ;;  %v2235_v29 = vpop.f32.mrb[30].mxu1 }
 0x1ed   :  { %v2931_v56 = vadd.f32 %v2617_v1, %v2231_v28  ;;  %v2619_v20 = vpop.f32.mrb[29].mxu0  ;;  %v2237_v26 = vpop.f32.mrb[31].mxu1 }
 0x1ee   :  { %v2932_v6 = vadd.f32 %v2619_v20, %v2233_v10  ;;  %v2621_v34 = vpop.f32.mrb[30].mxu0 }
 0x1ef   :  { %2735 = vst [vmem:[%s5470_s3 + $0xe0] sm:$0xff] %v2931_v56  ;;  %v2933_v35 = vadd.f32 %v2621_v34, %v2235_v29  ;;  %v2623_v36 = vpop.f32.mrb[31].mxu0 }
 0x1f0   :  { %2736 = vst.msk [vmem:[%s5470_s3 + $0xe8] sm:$0xff] %vm2707_vm0, %v2932_v6  ;;  %v2934_v37 = vadd.f32 %v2623_v36, %v2237_v26 }
 0x1f1   :  { %2737 = vst [vmem:[%s5470_s3 + $0xf0] sm:$0xff] %v2933_v35 }
 0x1f2   :  { %2738 = vst.msk [vmem:[%s5470_s3 + $0xf8] sm:$0xff] %vm2707_vm0, %v2934_v37  ;;  %v2241_v38 = vpop.f32.mrb[32].mxu1 }
 0x1f3   :  { %v2243_v40 = vpop.f32.mrb[33].mxu1 }
 0x1f4   :  { %v2627_v42 = vpop.f32.mrb[32].mxu0  ;;  %v2245_v24 = vpop.f32.mrb[34].mxu1 }
 0x1f5   :  { %v2935_v25 = vadd.f32 %v2627_v42, %v2241_v38  ;;  %v2629_v43 = vpop.f32.mrb[33].mxu0  ;;  %v2247_v44 = vpop.f32.mrb[35].mxu1 }
 0x1f6   :  { %v2936_v41 = vadd.f32 %v2629_v43, %v2243_v40  ;;  %v2631_v39 = vpop.f32.mrb[34].mxu0 }
 0x1f7   :  { %2739 = vst [vmem:[%s5470_s3 + $0x100] sm:$0xff] %v2935_v25  ;;  %v2937_v47 = vadd.f32 %v2631_v39, %v2245_v24  ;;  %v2633_v50 = vpop.f32.mrb[35].mxu0 }
 0x1f8   :  { %2740 = vst.msk [vmem:[%s5470_s3 + $0x108] sm:$0xff] %vm2707_vm0, %v2936_v41  ;;  %v2938_v51 = vadd.f32 %v2633_v50, %v2247_v44 }
 0x1f9   :  { %2741 = vst [vmem:[%s5470_s3 + $0x110] sm:$0xff] %v2937_v47 }
 0x1fa   :  { %2742 = vst.msk [vmem:[%s5470_s3 + $0x118] sm:$0xff] %vm2707_vm0, %v2938_v51  ;;  %v2251_v45 = vpop.f32.mrb[36].mxu1 }
 0x1fb   :  { %v2253_v30 = vpop.f32.mrb[37].mxu1 }
 0x1fc   :  { %v2637_v31 = vpop.f32.mrb[36].mxu0  ;;  %v2255_v46 = vpop.f32.mrb[38].mxu1 }
 0x1fd   :  { %v2939_v48 = vadd.f32 %v2637_v31, %v2251_v45  ;;  %v2639_v49 = vpop.f32.mrb[37].mxu0  ;;  %v2257_v52 = vpop.f32.mrb[39].mxu1 }
 0x1fe   :  { %v2940_v53 = vadd.f32 %v2639_v49, %v2253_v30  ;;  %v2641_v32 = vpop.f32.mrb[38].mxu0 }
 0x1ff   :  { %2743 = vst [vmem:[%s5470_s3 + $0x120] sm:$0xff] %v2939_v48  ;;  %v2941_v33 = vadd.f32 %v2641_v32, %v2255_v46  ;;  %v2643_v54 = vpop.f32.mrb[39].mxu0 }
 0x200   :  { %2744 = vst.msk [vmem:[%s5470_s3 + $0x128] sm:$0xff] %vm2707_vm0, %v2940_v53  ;;  %v2942_v63 = vadd.f32 %v2643_v54, %v2257_v52 }
 0x201   :  { %2745 = vst [vmem:[%s5470_s3 + $0x130] sm:$0xff] %v2941_v33 }
 0x202   :  { %2746 = vst.msk [vmem:[%s5470_s3 + $0x138] sm:$0xff] %vm2707_vm0, %v2942_v63  ;;  %v2261_v0 = vpop.f32.mrb[40].mxu1 }
 0x203   :  { %v2263_v61 = vpop.f32.mrb[41].mxu1 }
 0x204   :  { %v2647_v62 = vpop.f32.mrb[40].mxu0  ;;  %v2265_v55 = vpop.f32.mrb[42].mxu1 }
 0x205   :  { %v2943_v58 = vadd.f32 %v2647_v62, %v2261_v0  ;;  %v2649_v5 = vpop.f32.mrb[41].mxu0  ;;  %v2267_v8 = vpop.f32.mrb[43].mxu1 }
 0x206   :  { %v2944_v9 = vadd.f32 %v2649_v5, %v2263_v61  ;;  %v2651_v2 = vpop.f32.mrb[42].mxu0 }
 0x207   :  { %2747 = vst [vmem:[%s5470_s3 + $0x140] sm:$0xff] %v2943_v58  ;;  %v2945_v11 = vadd.f32 %v2651_v2, %v2265_v55  ;;  %v2653_v12 = vpop.f32.mrb[43].mxu0 }
 0x208   :  { %2748 = vst.msk [vmem:[%s5470_s3 + $0x148] sm:$0xff] %vm2707_vm0, %v2944_v9  ;;  %v2946_v13 = vadd.f32 %v2653_v12, %v2267_v8 }
 0x209   :  { %2749 = vst [vmem:[%s5470_s3 + $0x150] sm:$0xff] %v2945_v11 }
 0x20a   :  { %2750 = vst.msk [vmem:[%s5470_s3 + $0x158] sm:$0xff] %vm2707_vm0, %v2946_v13  ;;  %v2271_v14 = vpop.f32.mrb[44].mxu1 }
 0x20b   :  { %v2273_v3 = vpop.f32.mrb[45].mxu1 }
 0x20c   :  { %v2657_v4 = vpop.f32.mrb[44].mxu0  ;;  %v2275_v57 = vpop.f32.mrb[46].mxu1 }
 0x20d   :  { %v2947_v15 = vadd.f32 %v2657_v4, %v2271_v14  ;;  %v2659_v17 = vpop.f32.mrb[45].mxu0  ;;  %v2277_v18 = vpop.f32.mrb[47].mxu1 }
 0x20e   :  { %v2948_v59 = vadd.f32 %v2659_v17, %v2273_v3  ;;  %v2661_v60 = vpop.f32.mrb[46].mxu0 }
 0x20f   :  { %2751 = vst [vmem:[%s5470_s3 + $0x160] sm:$0xff] %v2947_v15  ;;  %v2949_v19 = vadd.f32 %v2661_v60, %v2275_v57  ;;  %v2663_v7 = vpop.f32.mrb[47].mxu0 }
 0x210   :  { %2752 = vst.msk [vmem:[%s5470_s3 + $0x168] sm:$0xff] %vm2707_vm0, %v2948_v59  ;;  %v2950_v27 = vadd.f32 %v2663_v7, %v2277_v18 }
 0x211   :  { %2753 = vst [vmem:[%s5470_s3 + $0x170] sm:$0xff] %v2949_v19 }
 0x212   :  { %2754 = vst.msk [vmem:[%s5470_s3 + $0x178] sm:$0xff] %vm2707_vm0, %v2950_v27  ;;  %v2281_v16 = vpop.f32.mrb[48].mxu1 }
 0x213   :  { %v2283_v21 = vpop.f32.mrb[49].mxu1 }
 0x214   :  { %v2667_v22 = vpop.f32.mrb[48].mxu0  ;;  %v2285_v23 = vpop.f32.mrb[50].mxu1 }
 0x215   :  { %v2951_v28 = vadd.f32 %v2667_v22, %v2281_v16  ;;  %v2669_v10 = vpop.f32.mrb[49].mxu0  ;;  %v2287_v1 = vpop.f32.mrb[51].mxu1 }
 0x216   :  { %v2952_v29 = vadd.f32 %v2669_v10, %v2283_v21  ;;  %v2671_v56 = vpop.f32.mrb[50].mxu0 }
 0x217   :  { %2755 = vst [vmem:[%s5470_s3 + $0x180] sm:$0xff] %v2951_v28  ;;  %v2953_v20 = vadd.f32 %v2671_v56, %v2285_v23  ;;  %v2673_v26 = vpop.f32.mrb[51].mxu0 }
 0x218   :  { %2756 = vst.msk [vmem:[%s5470_s3 + $0x188] sm:$0xff] %vm2707_vm0, %v2952_v29  ;;  %v2954_v6 = vadd.f32 %v2673_v26, %v2287_v1 }
 0x219   :  { %2757 = vst [vmem:[%s5470_s3 + $0x190] sm:$0xff] %v2953_v20 }
 0x21a   :  { %2758 = vst.msk [vmem:[%s5470_s3 + $0x198] sm:$0xff] %vm2707_vm0, %v2954_v6  ;;  %v2291_v34 = vpop.f32.mrb[52].mxu1 }
 0x21b   :  { %v2293_v35 = vpop.f32.mrb[53].mxu1 }
 0x21c   :  { %v2677_v36 = vpop.f32.mrb[52].mxu0  ;;  %v2295_v37 = vpop.f32.mrb[54].mxu1 }
 0x21d   :  { %v2955_v38 = vadd.f32 %v2677_v36, %v2291_v34  ;;  %v2679_v40 = vpop.f32.mrb[53].mxu0  ;;  %v2297_v42 = vpop.f32.mrb[55].mxu1 }
 0x21e   :  { %v2956_v24 = vadd.f32 %v2679_v40, %v2293_v35  ;;  %v2681_v25 = vpop.f32.mrb[54].mxu0 }
 0x21f   :  { %2759 = vst [vmem:[%s5470_s3 + $0x1a0] sm:$0xff] %v2955_v38  ;;  %v2957_v43 = vadd.f32 %v2681_v25, %v2295_v37  ;;  %v2683_v44 = vpop.f32.mrb[55].mxu0 }
 0x220   :  { %2760 = vst.msk [vmem:[%s5470_s3 + $0x1a8] sm:$0xff] %vm2707_vm0, %v2956_v24  ;;  %v2958_v41 = vadd.f32 %v2683_v44, %v2297_v42 }
 0x221   :  { %2761 = vst [vmem:[%s5470_s3 + $0x1b0] sm:$0xff] %v2957_v43 }
 0x222   :  { %2762 = vst.msk [vmem:[%s5470_s3 + $0x1b8] sm:$0xff] %vm2707_vm0, %v2958_v41  ;;  %v2301_v39 = vpop.f32.mrb[56].mxu1 }
 0x223   :  { %v2303_v47 = vpop.f32.mrb[57].mxu1 }
 0x224   :  { %v2687_v50 = vpop.f32.mrb[56].mxu0  ;;  %v2305_v51 = vpop.f32.mrb[58].mxu1 }
 0x225   :  { %v2959_v45 = vadd.f32 %v2687_v50, %v2301_v39  ;;  %v2689_v30 = vpop.f32.mrb[57].mxu0  ;;  %v2307_v31 = vpop.f32.mrb[59].mxu1 }
 0x226   :  { %v2960_v46 = vadd.f32 %v2689_v30, %v2303_v47  ;;  %v2691_v48 = vpop.f32.mrb[58].mxu0 }
 0x227   :  { %2763 = vst [vmem:[%s5470_s3 + $0x1c0] sm:$0xff] %v2959_v45  ;;  %v2961_v49 = vadd.f32 %v2691_v48, %v2305_v51  ;;  %v2693_v52 = vpop.f32.mrb[59].mxu0 }
 0x228   :  { %2764 = vst.msk [vmem:[%s5470_s3 + $0x1c8] sm:$0xff] %vm2707_vm0, %v2960_v46  ;;  %v2962_v53 = vadd.f32 %v2693_v52, %v2307_v31 }
 0x229   :  { %2765 = vst [vmem:[%s5470_s3 + $0x1d0] sm:$0xff] %v2961_v49 }
 0x22a   :  { %2766 = vst.msk [vmem:[%s5470_s3 + $0x1d8] sm:$0xff] %vm2707_vm0, %v2962_v53  ;;  %v2311_v32 = vpop.f32.mrb[60].mxu1 }
 0x22b   :  { %v2313_v33 = vpop.f32.mrb[61].mxu1 }
 0x22c   :  { %v2697_v54 = vpop.f32.mrb[60].mxu0  ;;  %v2315_v63 = vpop.f32.mrb[62].mxu1 }
 0x22d   :  { %v2963_v0 = vadd.f32 %v2697_v54, %v2311_v32  ;;  %v2699_v61 = vpop.f32.mrb[61].mxu0  ;;  %v2317_v62 = vpop.f32.mrb[63].mxu1 }
 0x22e   :  { %v2964_v55 = vadd.f32 %v2699_v61, %v2313_v33  ;;  %v2701_v58 = vpop.f32.mrb[62].mxu0 }
 0x22f   :  { %2767 = vst [vmem:[%s5470_s3 + $0x1e0] sm:$0xff] %v2963_v0  ;;  %v2965_v5 = vadd.f32 %v2701_v58, %v2315_v63  ;;  %v2703_v8 = vpop.f32.mrb[63].mxu0 }
 0x230   :  { %2768 = vst.msk [vmem:[%s5470_s3 + $0x1e8] sm:$0xff] %vm2707_vm0, %v2964_v55  ;;  %v2966_v9 = vadd.f32 %v2703_v8, %v2317_v62 }
 0x231   :  { %2769 = vst [vmem:[%s5470_s3 + $0x1f0] sm:$0xff] %v2965_v5 }
 0x232   :  { %2770 = vst.msk [vmem:[%s5470_s3 + $0x1f8] sm:$0xff] %vm2707_vm0, %v2966_v9 }

</bundles_post_ra>
